<compile_context>
chip_gen: v7x
topology: tpu7x:2x2x1
jax: 0.10.0
libtpu: 0.0.40
codegen_flags: <defaults>
</compile_context>

<pallas_src>
import functools

import numpy as np
import jax
import jax.numpy as jnp
from jax.experimental import pallas as pl
from jax.experimental.pallas import tpu as pltpu

EPS = 1e-5  # BatchNorm2d default eps


def _conv_bn_relu_pool_kernel(p_ref, w_ref, gamma_ref, beta_ref,
                              o_ref,
                              sum_ref, sq_ref, scale_ref, shift_ref,
                              *, tile_q, n_conv_rows):
    """Two-phase tiled conv + BN + ReLU + 2x2-maxpool kernel.

    Grid = (2, num_tiles); program_id(0) is the phase:
      phase 0: one im2col GEMM per tile (bf16 MXU, f32 acc) covering all four 2x2
               pool-window members -> accumulate per-channel sum / sum^2 in VMEM scratch.
      phase 1: recompute the GEMM, apply folded BatchNorm (scale/shift) + ReLU, then the
               2x2 max-pool as an elementwise max over the four member row-slabs, store.

    The Conv2d bias is intentionally NOT applied: BatchNorm over batch statistics subtracts
    the per-channel mean (which absorbs the bias) and the variance is bias-invariant, so a
    per-channel conv bias cancels exactly.
    """
    phase = pl.program_id(0)
    tile = pl.program_id(1)

    # (4*tile_q, K9) bf16 @ (K9, Cout) bf16 -> f32: a single MXU GEMM per grid step.
    y = jnp.dot(p_ref[...], w_ref[...], preferred_element_type=jnp.float32)

    @pl.when((phase == 0) & (tile == 0))
    def _init_stats():
        sum_ref[...] = jnp.zeros_like(sum_ref)
        sq_ref[...] = jnp.zeros_like(sq_ref)

    @pl.when(phase == 0)
    def _accumulate_stats():
        sum_ref[...] += jnp.sum(y, axis=0, keepdims=True)
        sq_ref[...] += jnp.sum(y * y, axis=0, keepdims=True)

    @pl.when((phase == 1) & (tile == 0))
    def _finalize_stats():
        inv_n = jnp.float32(1.0 / n_conv_rows)
        mean = sum_ref[...] * inv_n
        var = sq_ref[...] * inv_n - mean * mean      # biased variance (BN training mode)
        inv_std = jax.lax.rsqrt(var + EPS)
        scale = gamma_ref[...] * inv_std
        scale_ref[...] = scale
        shift_ref[...] = beta_ref[...] - mean * scale

    @pl.when(phase == 1)
    def _apply_and_pool():
        a = jnp.maximum(y * scale_ref[...] + shift_ref[...], 0.0)
        # The four 2x2 pool-window members occupy consecutive tile_q-row slabs (static,
        # sublane-aligned slices): the pool is a pure elementwise max on the VPU.
        a00 = a[0 * tile_q:1 * tile_q, :]
        a01 = a[1 * tile_q:2 * tile_q, :]
        a10 = a[2 * tile_q:3 * tile_q, :]
        a11 = a[3 * tile_q:4 * tile_q, :]
        o_ref[...] = jnp.maximum(jnp.maximum(a00, a01), jnp.maximum(a10, a11))


def _pick_tile_q(q_rows, tile_q_max):
    """Largest multiple of 8 that divides q_rows and is <= tile_q_max."""
    cap = max(8, min(q_rows, tile_q_max))
    for cand in range(cap - cap % 8, 0, -8):
        if q_rows % cand == 0:
            return cand
    return q_rows  # tiny/awkward sizes: a single full-size tile (block == full dim)


def mini_conv_block_forward(x, w, b, gamma, beta, *, pool_size=2, tile_q_max=128):
    """x: (B0, B1, Cin, H, W); w: (Cout, Cin, KH, KW); b/gamma/beta: (Cout,).

    `b` is accepted for interface fidelity but never enters the kernel: with batch-stat
    BatchNorm the per-channel conv bias cancels exactly (verified against the reference).
    """
    del b  # exact cancellation under BatchNorm with batch statistics
    B0, B1, Cin, H, W = x.shape
    Cout, _, KH, KW = w.shape
    assert pool_size == 2, "kernel specialised for MaxPool2d(2)"
    assert H % 2 == 0 and W % 2 == 0
    padh, padw = KH // 2, KW // 2          # kernel_size=3, padding=1 -> "same" conv
    N = B0 * B1
    Ho, Wo = H, W
    Hp, Wp = Ho // 2, Wo // 2
    Q = N * Hp * Wp                        # pooled rows (kernel output rows)
    P = N * Ho * Wo                        # conv rows (BatchNorm reduces over these)
    K9 = KH * KW * Cin

    tile_q = _pick_tile_q(Q, tile_q_max)   # tile_q pooled rows == 4*tile_q conv rows / step
    num_tiles = Q // tile_q

    # ---- glue: NCHW -> NHWC, pad, im2col, grouped/tiled by 2x2 pool-window member ----
    # TODO(synk): at large MAML shapes, replace host-side im2col (9x input duplication)
    # with an in-kernel accumulation over the (kh, kw) taps; and cache the phase-0 conv
    # output (VMEM if it fits, HBM intermediate otherwise) to avoid the phase-1 recompute.
    x_nhwc = jnp.transpose(x.reshape(N, Cin, H, W), (0, 2, 3, 1))
    xp = jnp.pad(x_nhwc, ((0, 0), (padh, padh), (padw, padw), (0, 0)))
    cols = [xp[:, kh:kh + Ho, kw:kw + Wo, :] for kh in range(KH) for kw in range(KW)]
    patches = jnp.concatenate(cols, axis=-1).astype(jnp.bfloat16)   # (N, Ho, Wo, K9)
    # Four pool-window members, each (Q, K9) with rows in (n, hp, wp) order.
    members = jnp.stack([patches[:, dy::2, dx::2, :].reshape(Q, K9)
                         for dy in range(2) for dx in range(2)], axis=0)   # (4, Q, K9)
    # Interleave so that grid tile t sees its four member slabs as one contiguous 2-D block:
    # row layout (num_tiles, 4 members, tile_q) -> (4*Q, K9).
    p_all = (members.reshape(4, num_tiles, tile_q, K9)
                    .transpose(1, 0, 2, 3)
                    .reshape(4 * Q, K9))
    w2 = jnp.transpose(w, (2, 3, 1, 0)).reshape(K9, Cout).astype(jnp.bfloat16)
    g2 = gamma.reshape(1, Cout).astype(jnp.float32)
    be2 = beta.reshape(1, Cout).astype(jnp.float32)

    param_spec = pl.BlockSpec((1, Cout), lambda ph, t: (0, 0))

    out = pl.pallas_call(
        functools.partial(_conv_bn_relu_pool_kernel, tile_q=tile_q, n_conv_rows=P),
        out_shape=jax.ShapeDtypeStruct((Q, Cout), jnp.float32),
        grid=(2, num_tiles),
        in_specs=[pl.BlockSpec((4 * tile_q, K9), lambda ph, t: (t, 0)),
                  pl.BlockSpec((K9, Cout), lambda ph, t: (0, 0)),
                  param_spec, param_spec],
        # ph*t keeps the output block index pinned to 0 during the stats phase, so no block
        # is written back before phase 1 fills it; in phase 1 it walks 0..num_tiles-1.
        out_specs=pl.BlockSpec((tile_q, Cout), lambda ph, t: (ph * t, 0)),
        scratch_shapes=[pltpu.VMEM((1, Cout), jnp.float32) for _ in range(4)],
        compiler_params=pltpu.CompilerParams(
            # Both axes are sequential: phase 1 depends on the phase-0 scratch accumulation.
            # TODO(synk): on v7x, shard the tile axis across the 2 TensorCores and do a
            # cross-core reduction of the BN partial sums.
            dimension_semantics=("arbitrary", "arbitrary"),
            vmem_limit_bytes=32 * 1024 * 1024,   # explicit budget, fits v7x's 64 MiB VMEM
        ),
    )(p_all, w2, g2, be2)

    # Rows are (n, hp, wp), channel-last; convert to NCHW flatten order to match PyTorch.
    out = out.reshape(N, Hp, Wp, Cout).transpose(0, 3, 1, 2)       # (N, Cout, Hp, Wp)
    return out.reshape(B0, B1, Cout * Hp * Wp)


def _reference(x, w, b, gamma, beta, *, pool_size=2):
    """Pure-JAX f32 reference mirroring the PyTorch module (conv bias included)."""
    B0, B1, Cin, H, W = x.shape
    Cout = w.shape[0]
    N = B0 * B1
    x4 = x.reshape(N, Cin, H, W)
    y = jax.lax.conv_general_dilated(
        x4, w, window_strides=(1, 1), padding=((1, 1), (1, 1)),
        dimension_numbers=("NCHW", "OIHW", "NCHW"))
    y = y + b[None, :, None, None]
    mean = jnp.mean(y, axis=(0, 2, 3), keepdims=True)
    var = jnp.mean(jnp.square(y - mean), axis=(0, 2, 3), keepdims=True)
    y = (y - mean) * jax.lax.rsqrt(var + EPS)
    y = y * gamma[None, :, None, None] + beta[None, :, None, None]
    y = jnp.maximum(y, 0.0)
    Hp, Wp = H // pool_size, W // pool_size
    y = y.reshape(N, Cout, Hp, pool_size, Wp, pool_size)
    y = jnp.max(y, axis=(3, 5))
    return y.reshape(B0, B1, Cout * Hp * Wp)


if __name__ == "__main__":
    key = jax.random.PRNGKey(0)
    B0, B1, Cin, H, W = 2, 2, 4, 16, 16
    Cout = 8

    k1, k2, k3 = jax.random.split(key, 3)
    x = jax.random.normal(k1, (B0, B1, Cin, H, W), dtype=jnp.float32)
    # Conv2d(in_channels=4, out_channels=8, kernel_size=3, padding=1) parameters
    w = 0.1 * jax.random.normal(k2, (Cout, Cin, 3, 3), dtype=jnp.float32)
    b = 0.1 * jax.random.normal(k3, (Cout,), dtype=jnp.float32)
    # BatchNorm2d default affine init
    gamma = jnp.ones((Cout,), dtype=jnp.float32)
    beta = jnp.zeros((Cout,), dtype=jnp.float32)

    fwd = jax.jit(mini_conv_block_forward)
    out = jax.block_until_ready(fwd(x, w, b, gamma, beta))

    ref = _reference(x, w, b, gamma, beta)
    assert out.shape == (B0, B1, Cout * (H // 2) * (W // 2))
    np.testing.assert_allclose(np.asarray(out), np.asarray(ref), rtol=2e-2, atol=2e-2)

    print("KERNEL_OK")
</pallas_src>

<mosaic_0001>
module attributes {stable_mosaic.version = 11 : i64} {
  func.func @_conv_bn_relu_pool_kernel(%arg0: i32, %arg1: i32, %arg2: memref<512x36xbf16, #tpu.memory_space<vmem>>, %arg3: memref<36x8xbf16, #tpu.memory_space<vmem>>, %arg4: memref<1x8xf32, #tpu.memory_space<vmem>>, %arg5: memref<1x8xf32, #tpu.memory_space<vmem>>, %arg6: memref<128x8xf32, #tpu.memory_space<vmem>>, %arg7: memref<1x8xf32, #tpu.memory_space<vmem>>, %arg8: memref<1x8xf32, #tpu.memory_space<vmem>>, %arg9: memref<1x8xf32, #tpu.memory_space<vmem>>, %arg10: memref<1x8xf32, #tpu.memory_space<vmem>>) attributes {dimension_semantics = [#tpu.dimension_semantics<arbitrary>, #tpu.dimension_semantics<arbitrary>], iteration_bounds = array<i64: 2, 2>, scalar_prefetch = 0 : i64, scratch_operands = 4 : i64, tpu.core_type = #tpu.core_type<tc>, window_params = [{transform_indices = @transform_0, window_bounds = array<i64: 512, 36>}, {pipeline_mode = #tpu.pipeline_mode<synchronous>, transform_indices = @transform_1, window_bounds = array<i64: 36, 8>}, {pipeline_mode = #tpu.pipeline_mode<synchronous>, transform_indices = @transform_2, window_bounds = array<i64: 1, 8>}, {pipeline_mode = #tpu.pipeline_mode<synchronous>, transform_indices = @transform_3, window_bounds = array<i64: 1, 8>}, {transform_indices = @transform_4, window_bounds = array<i64: 128, 8>}]} {
    %c0 = arith.constant 0 : index
    %c0_0 = arith.constant 0 : index
    %0 = vector.load %arg2[%c0, %c0_0] : memref<512x36xbf16, #tpu.memory_space<vmem>>, vector<512x36xbf16>
    %c0_1 = arith.constant 0 : index
    %c0_2 = arith.constant 0 : index
    %1 = vector.load %arg3[%c0_1, %c0_2] : memref<36x8xbf16, #tpu.memory_space<vmem>>, vector<36x8xbf16>
    %cst = arith.constant dense<0.000000e+00> : vector<512x8xf32>
    %2 = tpu.matmul %0, %1, %cst {dimension_numbers = #tpu.dot_dimension_numbers<[1], [0], [0], [1], [0, 0, 1, 1], [], []>} : vector<512x36xbf16>, vector<36x8xbf16>, vector<512x8xf32> -> vector<512x8xf32>
    %c0_i32 = arith.constant 0 : i32
    %3 = arith.cmpi eq, %arg0, %c0_i32 : i32
    %c0_i32_3 = arith.constant 0 : i32
    %4 = arith.cmpi eq, %arg1, %c0_i32_3 : i32
    %5 = arith.andi %3, %4 : i1
    %6 = arith.extui %5 : i1 to i32
    %c0_i32_4 = arith.constant 0 : i32
    %7 = arith.cmpi ne, %6, %c0_i32_4 : i32
    scf.if %7 {
      %cst_11 = arith.constant 0.000000e+00 : f32
      %19 = vector.broadcast %cst_11 : f32 to vector<1x8xf32>
      %c0_12 = arith.constant 0 : index
      %c0_13 = arith.constant 0 : index
      %20 = vector.load %arg7[%c0_12, %c0_13] : memref<1x8xf32, #tpu.memory_space<vmem>>, vector<1x8xf32>
      tpu.vector_store %arg7[%c0_12, %c0_13], %19 {strides = array<i32>} : memref<1x8xf32, #tpu.memory_space<vmem>>, vector<1x8xf32>,
      %cst_14 = arith.constant 0.000000e+00 : f32
      %21 = vector.broadcast %cst_14 : f32 to vector<1x8xf32>
      %c0_15 = arith.constant 0 : index
      %c0_16 = arith.constant 0 : index
      %22 = vector.load %arg8[%c0_15, %c0_16] : memref<1x8xf32, #tpu.memory_space<vmem>>, vector<1x8xf32>
      tpu.vector_store %arg8[%c0_15, %c0_16], %21 {strides = array<i32>} : memref<1x8xf32, #tpu.memory_space<vmem>>, vector<1x8xf32>,
    } else {
    }
    %c0_i32_5 = arith.constant 0 : i32
    %8 = arith.cmpi eq, %arg0, %c0_i32_5 : i32
    %9 = arith.extui %8 : i1 to i32
    %c0_i32_6 = arith.constant 0 : i32
    %10 = arith.cmpi ne, %9, %c0_i32_6 : i32
    scf.if %10 {
      %c0_11 = arith.constant 0 : index
      %c0_12 = arith.constant 0 : index
      %19 = vector.load %arg7[%c0_11, %c0_12] : memref<1x8xf32, #tpu.memory_space<vmem>>, vector<1x8xf32>
      %cst_13 = arith.constant dense<0.000000e+00> : vector<8xf32>
      %20 = vector.multi_reduction <add>, %2, %cst_13 [0] : vector<512x8xf32> to vector<8xf32>
      %21 = vector.shape_cast %20 : vector<8xf32> to vector<1x8xf32>
      %22 = arith.addf %19, %21 : vector<1x8xf32>
      %c0_14 = arith.constant 0 : index
      %c0_15 = arith.constant 0 : index
      %23 = vector.load %arg7[%c0_14, %c0_15] : memref<1x8xf32, #tpu.memory_space<vmem>>, vector<1x8xf32>
      tpu.vector_store %arg7[%c0_14, %c0_15], %22 {strides = array<i32>} : memref<1x8xf32, #tpu.memory_space<vmem>>, vector<1x8xf32>,
      %c0_16 = arith.constant 0 : index
      %c0_17 = arith.constant 0 : index
      %24 = vector.load %arg8[%c0_16, %c0_17] : memref<1x8xf32, #tpu.memory_space<vmem>>, vector<1x8xf32>
      %25 = arith.mulf %2, %2 : vector<512x8xf32>
      %cst_18 = arith.constant dense<0.000000e+00> : vector<8xf32>
      %26 = vector.multi_reduction <add>, %25, %cst_18 [0] : vector<512x8xf32> to vector<8xf32>
      %27 = vector.shape_cast %26 : vector<8xf32> to vector<1x8xf32>
      %28 = arith.addf %24, %27 : vector<1x8xf32>
      %c0_19 = arith.constant 0 : index
      %c0_20 = arith.constant 0 : index
      %29 = vector.load %arg8[%c0_19, %c0_20] : memref<1x8xf32, #tpu.memory_space<vmem>>, vector<1x8xf32>
      tpu.vector_store %arg8[%c0_19, %c0_20], %28 {strides = array<i32>} : memref<1x8xf32, #tpu.memory_space<vmem>>, vector<1x8xf32>,
    } else {
    }
    %c1_i32 = arith.constant 1 : i32
    %11 = arith.cmpi eq, %arg0, %c1_i32 : i32
    %c0_i32_7 = arith.constant 0 : i32
    %12 = arith.cmpi eq, %arg1, %c0_i32_7 : i32
    %13 = arith.andi %11, %12 : i1
    %14 = arith.extui %13 : i1 to i32
    %c0_i32_8 = arith.constant 0 : i32
    %15 = arith.cmpi ne, %14, %c0_i32_8 : i32
    scf.if %15 {
      %c0_11 = arith.constant 0 : index
      %c0_12 = arith.constant 0 : index
      %19 = vector.load %arg7[%c0_11, %c0_12] : memref<1x8xf32, #tpu.memory_space<vmem>>, vector<1x8xf32>
      %cst_13 = arith.constant 9.765625E-4 : f32
      %20 = vector.broadcast %cst_13 : f32 to vector<1x8xf32>
      %21 = arith.mulf %19, %20 : vector<1x8xf32>
      %c0_14 = arith.constant 0 : index
      %c0_15 = arith.constant 0 : index
      %22 = vector.load %arg8[%c0_14, %c0_15] : memref<1x8xf32, #tpu.memory_space<vmem>>, vector<1x8xf32>
      %cst_16 = arith.constant 9.765625E-4 : f32
      %23 = vector.broadcast %cst_16 : f32 to vector<1x8xf32>
      %24 = arith.mulf %22, %23 : vector<1x8xf32>
      %25 = arith.mulf %21, %21 : vector<1x8xf32>
      %26 = arith.subf %24, %25 : vector<1x8xf32>
      %cst_17 = arith.constant 9.99999974E-6 : f32
      %27 = vector.broadcast %cst_17 : f32 to vector<1x8xf32>
      %28 = arith.addf %26, %27 : vector<1x8xf32>
      %29 = math.rsqrt %28 : vector<1x8xf32>
      %c0_18 = arith.constant 0 : index
      %c0_19 = arith.constant 0 : index
      %30 = vector.load %arg4[%c0_18, %c0_19] : memref<1x8xf32, #tpu.memory_space<vmem>>, vector<1x8xf32>
      %31 = arith.mulf %30, %29 : vector<1x8xf32>
      %c0_20 = arith.constant 0 : index
      %c0_21 = arith.constant 0 : index
      %32 = vector.load %arg9[%c0_20, %c0_21] : memref<1x8xf32, #tpu.memory_space<vmem>>, vector<1x8xf32>
      tpu.vector_store %arg9[%c0_20, %c0_21], %31 {strides = array<i32>} : memref<1x8xf32, #tpu.memory_space<vmem>>, vector<1x8xf32>,
      %c0_22 = arith.constant 0 : index
      %c0_23 = arith.constant 0 : index
      %33 = vector.load %arg5[%c0_22, %c0_23] : memref<1x8xf32, #tpu.memory_space<vmem>>, vector<1x8xf32>
      %34 = arith.mulf %21, %31 : vector<1x8xf32>
      %35 = arith.subf %33, %34 : vector<1x8xf32>
      %c0_24 = arith.constant 0 : index
      %c0_25 = arith.constant 0 : index
      %36 = vector.load %arg10[%c0_24, %c0_25] : memref<1x8xf32, #tpu.memory_space<vmem>>, vector<1x8xf32>
      tpu.vector_store %arg10[%c0_24, %c0_25], %35 {strides = array<i32>} : memref<1x8xf32, #tpu.memory_space<vmem>>, vector<1x8xf32>,
    } else {
    }
    %c1_i32_9 = arith.constant 1 : i32
    %16 = arith.cmpi eq, %arg0, %c1_i32_9 : i32
    %17 = arith.extui %16 : i1 to i32
    %c0_i32_10 = arith.constant 0 : i32
    %18 = arith.cmpi ne, %17, %c0_i32_10 : i32
    scf.if %18 {
      %c0_11 = arith.constant 0 : index
      %c0_12 = arith.constant 0 : index
      %19 = vector.load %arg9[%c0_11, %c0_12] : memref<1x8xf32, #tpu.memory_space<vmem>>, vector<1x8xf32>
      %20 = vector.broadcast %19 : vector<1x8xf32> to vector<512x8xf32>
      %21 = arith.mulf %2, %20 : vector<512x8xf32>
      %c0_13 = arith.constant 0 : index
      %c0_14 = arith.constant 0 : index
      %22 = vector.load %arg10[%c0_13, %c0_14] : memref<1x8xf32, #tpu.memory_space<vmem>>, vector<1x8xf32>
      %23 = vector.broadcast %22 : vector<1x8xf32> to vector<512x8xf32>
      %24 = arith.addf %21, %23 : vector<512x8xf32>
      %cst_15 = arith.constant 0.000000e+00 : f32
      %25 = vector.broadcast %cst_15 : f32 to vector<512x8xf32>
      %26 = arith.maximumf %24, %25 : vector<512x8xf32>
      %27 = vector.extract_strided_slice %26 {offsets = [0, 0], sizes = [128, 8], strides = [1, 1]} : vector<512x8xf32> to vector<128x8xf32>
      %28 = vector.extract_strided_slice %26 {offsets = [128, 0], sizes = [128, 8], strides = [1, 1]} : vector<512x8xf32> to vector<128x8xf32>
      %29 = vector.extract_strided_slice %26 {offsets = [256, 0], sizes = [128, 8], strides = [1, 1]} : vector<512x8xf32> to vector<128x8xf32>
      %30 = vector.extract_strided_slice %26 {offsets = [384, 0], sizes = [128, 8], strides = [1, 1]} : vector<512x8xf32> to vector<128x8xf32>
      %31 = arith.maximumf %27, %28 : vector<128x8xf32>
      %32 = arith.maximumf %29, %30 : vector<128x8xf32>
      %33 = arith.maximumf %31, %32 : vector<128x8xf32>
      %c0_16 = arith.constant 0 : index
      %c0_17 = arith.constant 0 : index
      %34 = vector.load %arg6[%c0_16, %c0_17] : memref<128x8xf32, #tpu.memory_space<vmem>>, vector<128x8xf32>
      tpu.vector_store %arg6[%c0_16, %c0_17], %33 {strides = array<i32>} : memref<128x8xf32, #tpu.memory_space<vmem>>, vector<128x8xf32>,
    } else {
    }
    return
  }
  func.func @transform_0(%arg0: i32, %arg1: i32) -> (i32, i32) {
    %c0_i32 = arith.constant 0 : i32
    %c0_i32_0 = arith.constant 0 : i32
    return %arg1, %c0_i32 : i32, i32
  }
  func.func @transform_1(%arg0: i32, %arg1: i32) -> (i32, i32) {
    %c0_i32 = arith.constant 0 : i32
    %c0_i32_0 = arith.constant 0 : i32
    %c0_i32_1 = arith.constant 0 : i32
    return %c0_i32, %c0_i32_0 : i32, i32
  }
  func.func @transform_2(%arg0: i32, %arg1: i32) -> (i32, i32) {
    %c0_i32 = arith.constant 0 : i32
    %c0_i32_0 = arith.constant 0 : i32
    %c0_i32_1 = arith.constant 0 : i32
    return %c0_i32, %c0_i32_0 : i32, i32
  }
  func.func @transform_3(%arg0: i32, %arg1: i32) -> (i32, i32) {
    %c0_i32 = arith.constant 0 : i32
    %c0_i32_0 = arith.constant 0 : i32
    %c0_i32_1 = arith.constant 0 : i32
    return %c0_i32, %c0_i32_0 : i32, i32
  }
  func.func @transform_4(%arg0: i32, %arg1: i32) -> (i32, i32) {
    %0 = arith.muli %arg0, %arg1 : i32
    %c0_i32 = arith.constant 0 : i32
    %c0_i32_0 = arith.constant 0 : i32
    return %0, %c0_i32 : i32, i32
  }
}

</mosaic_0001>

<bundles_post_ra>
// kernel: mini_conv_block_forward.1
= control target key start
LH: loop header
LB: loop body
LE: loop exit
PB: predicated region body
PF: predicated region fallthrough
CT: control target
= control target key end

     0   :  { %s1908_s15 = smov 0   ;;  %s1910_s16 = smov 0   ;;  %s2742_s0 = inlined_call_operand.vmem [shape: bf16[1024,36], index: 0, kind: input, shape index: {}]   ;;  %s2743_s1 = inlined_call_operand.vmem [shape: bf16[36,8], index: 1, kind: input, shape index: {}]   ;;  %s2744_s2 = inlined_call_operand.vmem [shape: f32[1,8], index: 2, kind: input, shape index: {}]   ;;  %s2745_s3 = inlined_call_operand.vmem [shape: f32[1,8], index: 3, kind: input, shape index: {}]   ;;  %s2746_s4 = inlined_call_operand.vmem [shape: f32[256,8], index: 4, kind: output, shape index: {}]  }
   0x1   :  { %s1912_s17 = smov 0   ;;  %s1914_s18 = smov 0  }
   0x2   :  { %s1916_s19 = smov 0  }
   0x3 LB: > { %s23_s20 = sadd.s32 1, %s1872_s17  ;;  %s26_s21 = sadd.s32 1, %s1876_s18  ;;  %s1880_s19 = sphi %s1916_s19, %s14_s19   ;;  %s1876_s18 = sphi %s1914_s18, %s2867_s18   ;;  %s1872_s17 = sphi %s1912_s17, %s2866_s17   ;;  %s1868_s16 = sphi %s1910_s16, %s2865_s16   ;;  %s1864_s15 = sphi %s1908_s15, %s2864_s15  }
   0x4   : > { %p24_p0 = scmp.ge.s32.totalorder %s23_s20, 2  ;;  %p1573_p1 = scmp.ge.s32.totalorder %s1880_s19, 1 }
   0x5   : > { %p177_p2 = scmp.lt.s32.totalorder %s1880_s19, 5 }
   0x6   : > { %s2869_s20 = smov (%p24_p0, %s23_s20), 0  ;;  %s2871_s21 = smov (!%p24_p0, %s26_s21), %s1876_s18 }
   0x7   : > { %p178_p3 = pnand %p1573_p1, %p177_p2  ;;  %p28_p4 = scmp.ge.s32.totalorder %s2871_s21, 2 }
   0x9   : > { %s2873_s21 = smov (%p28_p4, %s2871_s21), 0  ;;  %181 = sbr.rel (%p178_p3) target bundleno = 578 (0x242), region = 36 }
  0x10   : > { %s210_s22 = smul.u32 %s1864_s15, %s1868_s16  ;;  %v1805_v0 = vld [vmem:[%s2743_s1] sm:$0xff]   ;;  %v1806_v1 = vld [vmem:[%s2743_s1 + $0x8] sm:$0xff]   ;;  %s1574_s27 = sshll.u32 %s1864_s15, 6  ;;  %v1807_v2 = vld [vmem:[%s2743_s1 + $0x10] ss:$0 sps:$4 sm:$0x33]  }
  0x11   : > { %1686 = vmatprep.subr.bf16.mxu0 %v1805_v0  ;;  %1756 = vmatprep.subr.bf16.mxu1 %v1805_v0  ;;  %p205_p6 = scmp.lt.s32.totalorder %s1574_s27, 127  ;;  %vm560_vm0 = vcmask 1041408   ;;  %vm463_vm1 = vcmask 293888   ;;  %p853_p7 = scmp.eq.s32.totalorder %s1868_s16, 0 }
  0x12   : > { %s1576_s28 = sshll.u32 %s210_s22, 4  ;;  %1687 = vmatpush3.bf16.msra.mxu0 %v1805_v0  ;;  %1759 = vmatpush3.bf16.msra.mxu1 %v1805_v0  ;;  %v562_v3 = vsel %vm560_vm0, %v1807_v2, 0  ;;  %p854_p8 = scmp.eq.s32.totalorder %s1864_s15, 0 }
  0x13   : > { %p212_p5 = scmp.lt.s32.totalorder %s1576_s28, 31  ;;  %1688 = vmatprep.subr.bf16.mxu0 %v1806_v1  ;;  %1757 = vmatprep.subr.bf16.mxu1 %v1806_v1  ;;  %s2877_s27 = smov (!%p205_p6, %s1574_s27), 127 }
  0x14   : > { %s1575_s9 = sshll.u32 %s2877_s27, 2  ;;  %p2032_p9 = pnand %p854_p8, %p853_p7 }
  0x15   : > { %s2875_s28 = smov (!%p212_p5, %s1576_s28), 31  ;;  %s1962_s12 = scalar_lea.vmem %s2742_s0, %s1575_s9  ;;  %vm859_vm2 = vcmask (!%p2032_p9), 57344  }
  0x16   : > { %s1577_s5 = sshll.u32 %s2875_s28, 3  ;;  %1689 = vmatpush3.bf16.msra.mxu0 %v1806_v1  ;;  %1760 = vmatpush3.bf16.msra.mxu1 %v1806_v1  ;;  %v1808_v4 = vld [vmem:[%s1962_s12] sm:$0xff]   ;;  %v1810_v6 = vld [vmem:[%s1962_s12 + $0x8] sm:$0xff]   ;;  %v1812_v8 = vld [vmem:[%s1962_s12 + $0x10] sm:$0xff]  }
  0x17   : > { %s1957_s8 = scalar_lea.vmem %s2746_s4, %s1577_s5  ;;  %1762 = vmatprep.subr.msk.bf16.mxu0 %vm560_vm0, %v1807_v2  ;;  %1763 = vmatprep.subr.msk.bf16.mxu1 %vm560_vm0, %v1807_v2  ;;  %v1809_v5 = vld [vmem:[%s1962_s12 + $0x80] sm:$0xff]   ;;  %v1811_v7 = vld [vmem:[%s1962_s12 + $0x88] sm:$0xff]   ;;  %v1813_v9 = vld [vmem:[%s1962_s12 + $0x90] sm:$0xff]  }
  0x18   : > { %1692 = vmatprep.mubr.msk.bf16.mxu0 %vm463_vm1, %v1808_v4  ;;  %1724 = vmatprep.mubr.msk.bf16.mxu1 %vm463_vm1, %v1809_v5  ;;  %v1814_v10 = vld [vmem:[%s1962_s12 + $0x18] sm:$0xff]   ;;  %v1816_v12 = vld [vmem:[%s1962_s12 + $0x20] sm:$0xff]   ;;  %v1818_v14 = vld [vmem:[%s1962_s12 + $0x28] sm:$0xff]  }
  0x19   : > { %v1815_v11 = vld [vmem:[%s1962_s12 + $0x98] sm:$0xff]   ;;  %v1817_v13 = vld [vmem:[%s1962_s12 + $0xa0] sm:$0xff]   ;;  %v1819_v15 = vld [vmem:[%s1962_s12 + $0xa8] sm:$0xff]  }
  0x1a   : > { %1691 = vmatpush3.bf16.msra.mxu0 %v562_v3  ;;  %1761 = vmatpush3.bf16.msra.mxu1 %v562_v3  ;;  %v1820_v16 = vld [vmem:[%s1962_s12 + $0x30] sm:$0xff]   ;;  %v1822_v18 = vld [vmem:[%s1962_s12 + $0x38] sm:$0xff]   ;;  %v1824_v20 = vld [vmem:[%s1962_s12 + $0x40] sm:$0xff]  }
  0x1b   : > { %v1821_v17 = vld [vmem:[%s1962_s12 + $0xb0] sm:$0xff]   ;;  %v1823_v19 = vld [vmem:[%s1962_s12 + $0xb8] sm:$0xff]   ;;  %v1825_v21 = vld [vmem:[%s1962_s12 + $0xc0] sm:$0xff]  }
  0x1c   : > { %v1826_v22 = vld [vmem:[%s1962_s12 + $0x48] sm:$0xff]   ;;  %v1828_v24 = vld [vmem:[%s1962_s12 + $0x50] sm:$0xff]   ;;  %v1830_v26 = vld [vmem:[%s1962_s12 + $0x58] sm:$0xff]  }
  0x1d   : > { %1693 = vmatmul.mubr.msk.bf16.vlgmr.msra.gmra.mrb[0].mxu0 %vm463_vm1, %v1810_v6  ;;  %1725 = vmatmul.mubr.msk.bf16.vlgmr.msra.gmra.mrb[0].mxu1 %vm463_vm1, %v1811_v7  ;;  %v1827_v23 = vld [vmem:[%s1962_s12 + $0xc8] sm:$0xff]   ;;  %v1829_v25 = vld [vmem:[%s1962_s12 + $0xd0] sm:$0xff]   ;;  %v1831_v27 = vld [vmem:[%s1962_s12 + $0xd8] sm:$0xff]  }
  0x1e   : > { %1696 = vmatprep.mubr.msk.bf16.mxu0 %vm463_vm1, %v1812_v8  ;;  %1728 = vmatprep.mubr.msk.bf16.mxu1 %vm463_vm1, %v1813_v9  ;;  %v1832_v28 = vld [vmem:[%s1962_s12 + $0x60] sm:$0xff]   ;;  %v1834_v30 = vld [vmem:[%s1962_s12 + $0x68] sm:$0xff]   ;;  %v1836_v32 = vld [vmem:[%s1962_s12 + $0x70] sm:$0xff]  }
  0x1f   : > { %v1833_v29 = vld [vmem:[%s1962_s12 + $0xe0] sm:$0xff]   ;;  %v1835_v31 = vld [vmem:[%s1962_s12 + $0xe8] sm:$0xff]   ;;  %v1837_v33 = vld [vmem:[%s1962_s12 + $0xf0] sm:$0xff]  }
  0x20   : > { %v1838_v34 = vld [vmem:[%s1962_s12 + $0x78] sm:$0xff]  }
  0x21   : > { %v1839_v35 = vld [vmem:[%s1962_s12 + $0xf8] sm:$0xff]  }
  0x25   : > { %1697 = vmatmul.mubr.msk.bf16.gmra.mrb[4].mxu0 %vm463_vm1, %v1814_v10  ;;  %1729 = vmatmul.mubr.msk.bf16.gmra.mrb[4].mxu1 %vm463_vm1, %v1815_v11 }
  0x26   : > { %1700 = vmatprep.mubr.msk.bf16.mxu0 %vm463_vm1, %v1816_v12  ;;  %1732 = vmatprep.mubr.msk.bf16.mxu1 %vm463_vm1, %v1817_v13 }
  0x2d   : > { %1701 = vmatmul.mubr.msk.bf16.gmra.mrb[8].mxu0 %vm463_vm1, %v1818_v14  ;;  %1733 = vmatmul.mubr.msk.bf16.gmra.mrb[8].mxu1 %vm463_vm1, %v1819_v15 }
  0x2e   : > { %1704 = vmatprep.mubr.msk.bf16.mxu0 %vm463_vm1, %v1820_v16  ;;  %1736 = vmatprep.mubr.msk.bf16.mxu1 %vm463_vm1, %v1821_v17 }
  0x35   : > { %1705 = vmatmul.mubr.msk.bf16.gmra.mrb[12].mxu0 %vm463_vm1, %v1822_v18  ;;  %1737 = vmatmul.mubr.msk.bf16.gmra.mrb[12].mxu1 %vm463_vm1, %v1823_v19 }
  0x36   : > { %1708 = vmatprep.mubr.msk.bf16.mxu0 %vm463_vm1, %v1824_v20  ;;  %1740 = vmatprep.mubr.msk.bf16.mxu1 %vm463_vm1, %v1825_v21 }
  0x3d   : > { %1709 = vmatmul.mubr.msk.bf16.gmra.mrb[16].mxu0 %vm463_vm1, %v1826_v22  ;;  %1741 = vmatmul.mubr.msk.bf16.gmra.mrb[16].mxu1 %vm463_vm1, %v1827_v23 }
  0x3e   : > { %1712 = vmatprep.mubr.msk.bf16.mxu0 %vm463_vm1, %v1828_v24  ;;  %1744 = vmatprep.mubr.msk.bf16.mxu1 %vm463_vm1, %v1829_v25 }
  0x45   : > { %1713 = vmatmul.mubr.msk.bf16.gmra.mrb[20].mxu0 %vm463_vm1, %v1830_v26  ;;  %1745 = vmatmul.mubr.msk.bf16.gmra.mrb[20].mxu1 %vm463_vm1, %v1831_v27 }
  0x46   : > { %1716 = vmatprep.mubr.msk.bf16.mxu0 %vm463_vm1, %v1832_v28  ;;  %1748 = vmatprep.mubr.msk.bf16.mxu1 %vm463_vm1, %v1833_v29 }
  0x4d   : > { %1717 = vmatmul.mubr.msk.bf16.gmra.mrb[24].mxu0 %vm463_vm1, %v1834_v30  ;;  %1749 = vmatmul.mubr.msk.bf16.gmra.mrb[24].mxu1 %vm463_vm1, %v1835_v31 }
  0x4e   : > { %1720 = vmatprep.mubr.msk.bf16.mxu0 %vm463_vm1, %v1836_v32  ;;  %1752 = vmatprep.mubr.msk.bf16.mxu1 %vm463_vm1, %v1837_v33 }
  0x55   : > { %1721 = vmatmul.mubr.msk.bf16.gmra.mrb[28].mxu0 %vm463_vm1, %v1838_v34  ;;  %1753 = vmatmul.mubr.msk.bf16.gmra.mrb[28].mxu1 %vm463_vm1, %v1839_v35 }
  0xf0   : > { %v2036_v36 = vpop.f32.mrb[0].mxu0  ;;  %v2038_v37 = vpop.f32.mrb[0].mxu1 }
  0xf1   : > { %2782 = vst [vmem:[#allocation6_spill] sm:$0xff] %v2036_v36  ;;  %v2040_v38 = vpop.f32.mrb[1].mxu0  ;;  %v2042_v39 = vpop.f32.mrb[1].mxu1 }
  0xf2   : > { %2783 = vst [vmem:[#allocation7_spill] sm:$0xff] %v2040_v38  ;;  %v2044_v40 = vpop.f32.mrb[2].mxu0  ;;  %v2046_v41 = vpop.f32.mrb[2].mxu1 }
  0xf3   : > { %2784 = vst [vmem:[#allocation8_spill] sm:$0xff] %v2044_v40  ;;  %v2048_v42 = vpop.f32.mrb[3].mxu0  ;;  %v2050_v43 = vpop.f32.mrb[3].mxu1 }
  0xf4   : > { %2785 = vst [vmem:[#allocation9_spill] sm:$0xff] %v2048_v42 }
  0xf8   : > { %v2052_v44 = vpop.f32.mrb[4].mxu0  ;;  %v2054_v45 = vpop.f32.mrb[4].mxu1 }
  0xf9   : > { %v2056_v46 = vpop.f32.mrb[5].mxu0  ;;  %v2058_v47 = vpop.f32.mrb[5].mxu1 }
  0xfa   : > { %2786 = vst [vmem:[#allocation10_spill] sm:$0xff] %v2056_v46  ;;  %v2060_v48 = vpop.f32.mrb[6].mxu0  ;;  %v2062_v49 = vpop.f32.mrb[6].mxu1 }
  0xfb   : > { %v2064_v50 = vpop.f32.mrb[7].mxu0  ;;  %v2066_v51 = vpop.f32.mrb[7].mxu1 }
 0x100   : > { %v2068_v52 = vpop.f32.mrb[8].mxu0  ;;  %v2070_v53 = vpop.f32.mrb[8].mxu1 }
 0x101   : > { %2787 = vst [vmem:[#allocation11_spill] sm:$0xff] %v2070_v53  ;;  %v2072_v54 = vpop.f32.mrb[9].mxu0  ;;  %v2074_v55 = vpop.f32.mrb[9].mxu1 }
 0x102   : > { %v2076_v56 = vpop.f32.mrb[10].mxu0  ;;  %v2078_v57 = vpop.f32.mrb[10].mxu1 }
 0x103   : > { %2788 = vst [vmem:[#allocation12_spill] sm:$0xff] %v2076_v56  ;;  %2789 = vst [vmem:[#allocation13_spill] sm:$0xff] %v2078_v57  ;;  %v2080_v58 = vpop.f32.mrb[11].mxu0  ;;  %v2082_v59 = vpop.f32.mrb[11].mxu1 }
 0x108   : > { %v2084_v60 = vpop.f32.mrb[12].mxu0  ;;  %v2086_v61 = vpop.f32.mrb[12].mxu1 }
 0x109   : > { %2790 = vst [vmem:[#allocation14_spill] sm:$0xff] %v2084_v60  ;;  %2791 = vst [vmem:[#allocation15_spill] sm:$0xff] %v2086_v61  ;;  %v2088_v62 = vpop.f32.mrb[13].mxu0  ;;  %v2090_v63 = vpop.f32.mrb[13].mxu1 }
 0x10a   : > { %2792 = vst [vmem:[#allocation16_spill] sm:$0xff] %v2088_v62  ;;  %2793 = vst [vmem:[#allocation17_spill] sm:$0xff] %v2090_v63  ;;  %v2092_v0 = vpop.f32.mrb[14].mxu0  ;;  %v2094_v1 = vpop.f32.mrb[14].mxu1 }
 0x10b   : > { %2794 = vst [vmem:[#allocation18_spill] sm:$0xff] %v2092_v0  ;;  %v2096_v2 = vpop.f32.mrb[15].mxu0  ;;  %v2098_v3 = vpop.f32.mrb[15].mxu1 }
 0x10c   : > { %2795 = vst [vmem:[#allocation19_spill] sm:$0xff] %v2096_v2  ;;  %2796 = vst [vmem:[#allocation20_spill] sm:$0xff] %v2098_v3 }
 0x110   : > { %v2100_v4 = vpop.f32.mrb[16].mxu0  ;;  %v2102_v5 = vpop.f32.mrb[16].mxu1 }
 0x111   : > { %2797 = vst [vmem:[#allocation21_spill] sm:$0xff] %v2102_v5  ;;  %v2104_v6 = vpop.f32.mrb[17].mxu0  ;;  %v2106_v7 = vpop.f32.mrb[17].mxu1 }
 0x112   : > { %v2108_v8 = vpop.f32.mrb[18].mxu0  ;;  %v2110_v9 = vpop.f32.mrb[18].mxu1 }
 0x113   : > { %2798 = vst [vmem:[#allocation22_spill] sm:$0xff] %v2110_v9  ;;  %v2112_v10 = vpop.f32.mrb[19].mxu0  ;;  %v2114_v11 = vpop.f32.mrb[19].mxu1 }
 0x118   : > { %v2116_v12 = vpop.f32.mrb[20].mxu0  ;;  %v2118_v13 = vpop.f32.mrb[20].mxu1 }
 0x119   : > { %2799 = vst [vmem:[#allocation23_spill] sm:$0xff] %v2118_v13  ;;  %v2120_v14 = vpop.f32.mrb[21].mxu0  ;;  %v2122_v15 = vpop.f32.mrb[21].mxu1 }
 0x11a   : > { %2800 = vst [vmem:[#allocation24_spill] sm:$0xff] %v2122_v15  ;;  %v2124_v16 = vpop.f32.mrb[22].mxu0  ;;  %v2126_v17 = vpop.f32.mrb[22].mxu1 }
 0x11b   : > { %2801 = vst [vmem:[#allocation25_spill] sm:$0xff] %v2126_v17  ;;  %v2128_v18 = vpop.f32.mrb[23].mxu0  ;;  %v2130_v19 = vpop.f32.mrb[23].mxu1 }
 0x11c   : > { %2802 = vst [vmem:[#allocation26_spill] sm:$0xff] %v2130_v19 }
 0x120   : > { %v2132_v20 = vpop.f32.mrb[24].mxu0  ;;  %v2134_v21 = vpop.f32.mrb[24].mxu1 }
 0x121   : > { %2803 = vst [vmem:[#allocation27_spill] sm:$0xff] %v2134_v21  ;;  %v2136_v22 = vpop.f32.mrb[25].mxu0  ;;  %v2138_v23 = vpop.f32.mrb[25].mxu1 }
 0x122   : > { %2804 = vst [vmem:[#allocation28_spill] sm:$0xff] %v2138_v23  ;;  %v2140_v24 = vpop.f32.mrb[26].mxu0  ;;  %v2142_v25 = vpop.f32.mrb[26].mxu1 }
 0x123   : > { %2805 = vst [vmem:[#allocation29_spill] sm:$0xff] %v2140_v24  ;;  %2806 = vst [vmem:[#allocation30_spill] sm:$0xff] %v2142_v25  ;;  %v2144_v26 = vpop.f32.mrb[27].mxu0  ;;  %v2146_v27 = vpop.f32.mrb[27].mxu1  ;;  %v1882_v25 = vmov (!%p2032_p9), 0.0  }
 0x124   : > { %2807 = vst [vmem:[#allocation31_spill] sm:$0xff] %v2146_v27  ;;  %860 = vst.msk [vmem:[#allocation2] sm:$0x1] (!%p2032_p9), %vm859_vm2, %v1882_v25 }
 0x125   : > { %861 = vst.msk [vmem:[#allocation3] sm:$0x1] (!%p2032_p9), %vm859_vm2, %v1882_v25 }
 0x126   : > { %858 = sbr.rel (%p2032_p9) target bundleno = 301 (0x12d), region = 40 }
 0x128   : > { %v2148_v28 = vpop.f32.mrb[28].mxu0  ;;  %v2150_v29 = vpop.f32.mrb[28].mxu1 }
 0x129   : > { %2808 = vst [vmem:[#allocation32_spill] sm:$0xff] %v2148_v28  ;;  %2809 = vst [vmem:[#allocation33_spill] sm:$0xff] %v2150_v29  ;;  %v2152_v30 = vpop.f32.mrb[29].mxu0  ;;  %v2154_v31 = vpop.f32.mrb[29].mxu1 }
 0x12a   : > { %2810 = vst [vmem:[#allocation34_spill] sm:$0xff] %v2152_v30  ;;  %2811 = vst [vmem:[#allocation35_spill] sm:$0xff] %v2154_v31  ;;  %v2156_v32 = vpop.f32.mrb[30].mxu0  ;;  %v2158_v33 = vpop.f32.mrb[30].mxu1 }
 0x12b   : > { %2812 = vst [vmem:[#allocation36_spill] sm:$0xff] %v2156_v32  ;;  %2813 = vst [vmem:[#allocation37_spill] sm:$0xff] %v2158_v33  ;;  %v2160_v34 = vpop.f32.mrb[31].mxu0  ;;  %v2162_v35 = vpop.f32.mrb[31].mxu1 }
 0x12c   : > { %2814 = vst [vmem:[#allocation38_spill] sm:$0xff] %v2160_v34  ;;  %2815 = vst [vmem:[#allocation39_spill] sm:$0xff] %v2162_v35 }
 0x12d PF: > { %p1645_p10 = scmp.ne.s32.totalorder %s1868_s16, 0 }
 0x12e   : > { %vm866_vm3 = vcmask (!%p1645_p10), 64512   ;;  %vm1001_vm4 = vcmask (!%p1645_p10), 57344  }
 0x12f   : > { %864 = sbr.rel (%p1645_p10) target bundleno = 477 (0x1dd), region = 44  ;;  %v867_v29 = vsel (!%p1645_p10), %vm866_vm3, %v2040_v38, 0.0  ;;  %v868_v33 = vsel (!%p1645_p10), %vm866_vm3, %v2048_v42, 0.0  ;;  %v870_v35 = vsel (!%p1645_p10), %vm866_vm3, %v2036_v36, 0.0  ;;  %v872_v21 = vsel (!%p1645_p10), %vm866_vm3, %v2044_v40, 0.0 }
 0x130   : > { %v869_v31 = vadd.f32 (!%p1645_p10), %v868_v33, %v867_v29  ;;  %v874_v25 = vsel (!%p1645_p10), %vm866_vm3, %v2056_v46, 0.0  ;;  %v876_v17 = vsel (!%p1645_p10), %vm866_vm3, %v2064_v50, 0.0  ;;  %v878_v19 = vsel (!%p1645_p10), %vm866_vm3, %v2052_v44, 0.0 }
 0x131   : > { %v880_v9 = vsel (!%p1645_p10), %vm866_vm3, %v2060_v48, 0.0  ;;  %v882_v33 = vsel (!%p1645_p10), %vm866_vm3, %v2072_v54, 0.0 }
 0x132   : > { %v871_v27 = vadd.f32 (!%p1645_p10), %v870_v35, %v869_v31  ;;  %v884_v35 = vsel (!%p1645_p10), %vm866_vm3, %v2080_v58, 0.0 }
 0x134   : > { %v873_v23 = vadd.f32 (!%p1645_p10), %v872_v21, %v871_v27  ;;  %v886_v27 = vsel (!%p1645_p10), %vm866_vm3, %v2068_v52, 0.0 }
 0x136   : > { %v875_v13 = vadd.f32 %v874_v25, %v873_v23  ;;  %v888_v25 = vsel %vm866_vm3, %v2076_v56, 0.0 }
 0x138   : > { %v877_v15 = vadd.f32 %v876_v17, %v875_v13  ;;  %v890_v17 = vsel %vm866_vm3, %v2088_v62, 0.0 }
 0x13a   : > { %v879_v29 = vadd.f32 %v878_v19, %v877_v15  ;;  %v892_v19 = vsel %vm866_vm3, %v2096_v2, 0.0 }
 0x13c   : > { %v881_v31 = vadd.f32 %v880_v9, %v879_v29  ;;  %v894_v29 = vsel %vm866_vm3, %v2084_v60, 0.0 }
 0x13e   : > { %v883_v21 = vadd.f32 %v882_v33, %v881_v31  ;;  %v896_v31 = vsel %vm866_vm3, %v2092_v0, 0.0 }
 0x140   : > { %v885_v23 = vadd.f32 %v884_v35, %v883_v21  ;;  %v898_v21 = vsel %vm866_vm3, %v2104_v6, 0.0 }
 0x142   : > { %v887_v13 = vadd.f32 %v886_v27, %v885_v23  ;;  %v900_v23 = vsel %vm866_vm3, %v2112_v10, 0.0 }
 0x144   : > { %v889_v15 = vadd.f32 %v888_v25, %v887_v13  ;;  %v902_v13 = vsel %vm866_vm3, %v2100_v4, 0.0 }
 0x146   : > { %v891_v9 = vadd.f32 %v890_v17, %v889_v15  ;;  %v1004_v17 = vmul.f32 %v2040_v38, %v2040_v38  ;;  %v1005_v15 = vmul.f32 %v2048_v42, %v2048_v42  ;;  %v908_v38 = vsel %vm866_vm3, %v2128_v18, 0.0 }
 0x148   : > { %v893_v33 = vadd.f32 %v892_v19, %v891_v9  ;;  %v1006_v19 = vmul.f32 %v2036_v36, %v2036_v36  ;;  %v1069_v42 = vsel %vm866_vm3, %v1005_v15, 0.0 }
 0x14a   : > { %v895_v35 = vadd.f32 %v894_v29, %v893_v33  ;;  %v904_v29 = vsel %vm866_vm3, %v2108_v8, 0.0  ;;  %v1007_v33 = vmul.f32 %v2044_v40, %v2044_v40  ;;  %v1071_v36 = vsel %vm866_vm3, %v1006_v19, 0.0 }
 0x14c   : > { %v897_v27 = vadd.f32 %v896_v31, %v895_v35  ;;  %v906_v35 = vsel %vm866_vm3, %v2120_v14, 0.0 }
 0x14e   : > { %v899_v25 = vadd.f32 %v898_v21, %v897_v27  ;;  %v1008_v21 = vmul.f32 %v2056_v46, %v2056_v46  ;;  %v1068_v27 = vsel %vm866_vm3, %v1004_v17, 0.0  ;;  %v910_v46 = vsel %vm866_vm3, %v2116_v12, 0.0 }
 0x14f   : > { %v1010_v17 = vmul.f32 %v2052_v44, %v2052_v44 }
 0x150   : > { %v901_v9 = vadd.f32 %v900_v23, %v899_v25  ;;  %v1070_v25 = vadd.f32 %v1069_v42, %v1068_v27  ;;  %v1075_v15 = vsel %vm866_vm3, %v1008_v21, 0.0  ;;  %v914_v27 = vsel %vm866_vm3, %v2136_v22, 0.0 }
 0x151   : > { %v1079_v21 = vsel %vm866_vm3, %v1010_v17, 0.0 }
 0x152   : > { %v903_v31 = vadd.f32 %v902_v13, %v901_v9  ;;  %v1009_v13 = vmul.f32 %v2064_v50, %v2064_v50  ;;  %v1073_v9 = vsel %vm866_vm3, %v1007_v33, 0.0  ;;  %v1072_v5 = vadd.f32 %v1071_v36, %v1070_v25 }
 0x153   : > { %v1013_v25 = vmul.f32 %v2080_v58, %v2080_v58 }
 0x154   : > { %v905_v23 = vadd.f32 %v904_v29, %v903_v31  ;;  %v1074_v42 = vadd.f32 %v1073_v9, %v1072_v5  ;;  %v912_v29 = vsel %vm866_vm3, %v2124_v16, 0.0  ;;  %v1011_v31 = vmul.f32 %v2060_v48, %v2060_v48 }
 0x155   : > { %v1077_v33 = vsel %vm866_vm3, %v1009_v13, 0.0  ;;  %v916_v5 = vsel %vm866_vm3, %v2144_v26, 0.0 }
 0x156   : > { %v907_v40 = vadd.f32 %v906_v35, %v905_v23  ;;  %v1076_v36 = vadd.f32 %v1075_v15, %v1074_v42  ;;  %v1012_v23 = vmul.f32 %v2072_v54, %v2072_v54  ;;  %v1081_v13 = vsel %vm866_vm3, %v1011_v31, 0.0 }
 0x157   : > { %v918_v15 = vsel %vm866_vm3, %v2132_v20, 0.0  ;;  %v1085_v31 = vsel %vm866_vm3, %v1013_v25, 0.0 }
 0x158   : > { %v909_v19 = vadd.f32 %v908_v38, %v907_v40  ;;  %v1078_v40 = vadd.f32 %v1077_v33, %v1076_v36  ;;  %v1083_v17 = vsel %vm866_vm3, %v1012_v23, 0.0  ;;  %v920_v33 = vsel %vm866_vm3, %v2140_v24, 0.0 }
 0x15a   : > { %v911_v35 = vadd.f32 %v910_v46, %v909_v19  ;;  %v1080_v9 = vadd.f32 %v1079_v21, %v1078_v40  ;;  %v1014_v19 = vmul.f32 %v2068_v52, %v2068_v52  ;;  %v922_v21 = vsel %vm866_vm3, %v2152_v30, 0.0 }
 0x15c   : > { %v913_v38 = vadd.f32 %v912_v29, %v911_v35  ;;  %v1082_v29 = vadd.f32 %v1081_v13, %v1080_v9  ;;  %v1015_v35 = vmul.f32 %v2076_v56, %v2076_v56  ;;  %v1087_v23 = vsel %vm866_vm3, %v1014_v19, 0.0 }
 0x15d   : > { %v924_v13 = vsel %vm866_vm3, %v2160_v34, 0.0  ;;  %v1048_v56 = vmul.f32 %v2090_v63, %v2090_v63 }
 0x15e   : > { %v915_v46 = vadd.f32 %v914_v27, %v913_v38  ;;  %v1084_v27 = vadd.f32 %v1083_v17, %v1082_v29  ;;  %v1016_v38 = vmul.f32 %v2088_v62, %v2088_v62  ;;  %v1089_v25 = vsel %vm866_vm3, %v1015_v35, 0.0 }
 0x15f   : > { %v926_v17 = vsel %vm866_vm3, %v2148_v28, 0.0  ;;  %v1046_v62 = vmul.f32 %v2070_v53, %v2070_v53 }
 0x160   : > { %v917_v42 = vadd.f32 %v916_v5, %v915_v46  ;;  %v1086_v5 = vadd.f32 %v1085_v31, %v1084_v27  ;;  %v1017_v46 = vmul.f32 %v2096_v2, %v2096_v2  ;;  %v1091_v19 = vsel %vm866_vm3, %v1016_v38, 0.0 }
 0x161   : > { %v928_v31 = vsel %vm866_vm3, %v2156_v32, 0.0  ;;  %v1044_v2 = vmul.f32 %v2074_v55, %v2074_v55 }
 0x162   : > { %v919_v36 = vadd.f32 %v918_v15, %v917_v42  ;;  %v1088_v15 = vadd.f32 %v1087_v23, %v1086_v5  ;;  %v1018_v42 = vmul.f32 %v2084_v60, %v2084_v60  ;;  %v1093_v35 = vsel %vm866_vm3, %v1017_v46, 0.0 }
 0x163   : > { %v930_v23 = vsel %vm866_vm3, %v2042_v39, 0.0  ;;  %v1042_v60 = vmul.f32 %v2054_v45, %v2054_v45 }
 0x164   : > { %v921_v40 = vadd.f32 %v920_v33, %v919_v36  ;;  %v1090_v33 = vadd.f32 %v1089_v25, %v1088_v15  ;;  %v1019_v36 = vmul.f32 %v2092_v0, %v2092_v0  ;;  %v1095_v38 = vsel %vm866_vm3, %v1018_v42, 0.0 }
 0x165   : > { %v932_v25 = vsel %vm866_vm3, %v2050_v43, 0.0  ;;  %v1040_v0 = vmul.f32 %v2058_v47, %v2058_v47 }
 0x166   : > { %v923_v9 = vadd.f32 %v922_v21, %v921_v40  ;;  %v1092_v21 = vadd.f32 %v1091_v19, %v1090_v33  ;;  %v1020_v40 = vmul.f32 %v2104_v6, %v2104_v6  ;;  %v1097_v46 = vsel %vm866_vm3, %v1019_v36, 0.0 }
 0x167   : > { %v934_v19 = vsel %vm866_vm3, %v2038_v37, 0.0 }
 0x168   : > { %v925_v29 = vadd.f32 %v924_v13, %v923_v9  ;;  %v1094_v13 = vadd.f32 %v1093_v35, %v1092_v21  ;;  %v1021_v9 = vmul.f32 %v2112_v10, %v2112_v10  ;;  %v1099_v42 = vsel %vm866_vm3, %v1020_v40, 0.0 }
 0x169   : > { %v936_v35 = vsel %vm866_vm3, %v2046_v41, 0.0 }
 0x16a   : > { %v927_v27 = vadd.f32 %v926_v17, %v925_v29  ;;  %v1096_v17 = vadd.f32 %v1095_v38, %v1094_v13  ;;  %v1022_v29 = vmul.f32 %v2100_v4, %v2100_v4  ;;  %v1101_v36 = vsel %vm866_vm3, %v1021_v9, 0.0 }
 0x16b   : > { %v938_v38 = vsel %vm866_vm3, %v2058_v47, 0.0 }
 0x16c   : > { %v929_v5 = vadd.f32 %v928_v31, %v927_v27  ;;  %v1098_v31 = vadd.f32 %v1097_v46, %v1096_v17  ;;  %v1023_v27 = vmul.f32 %v2108_v8, %v2108_v8  ;;  %v1103_v40 = vsel %vm866_vm3, %v1022_v29, 0.0 }
 0x16d   : > { %v940_v46 = vsel %vm866_vm3, %v2066_v51, 0.0 }
 0x16e   : > { %v931_v15 = vadd.f32 %v930_v23, %v929_v5  ;;  %v1100_v23 = vadd.f32 %v1099_v42, %v1098_v31  ;;  %v1024_v5 = vmul.f32 %v2120_v14, %v2120_v14  ;;  %v1105_v9 = vsel %vm866_vm3, %v1023_v27, 0.0 }
 0x16f   : > { %v942_v42 = vsel %vm866_vm3, %v2054_v45, 0.0 }
 0x170   : > { %v933_v33 = vadd.f32 %v932_v25, %v931_v15  ;;  %v1102_v25 = vadd.f32 %v1101_v36, %v1100_v23  ;;  %v1025_v15 = vmul.f32 %v2128_v18, %v2128_v18  ;;  %v1107_v29 = vsel %vm866_vm3, %v1024_v5, 0.0 }
 0x171   : > { %v944_v36 = vsel %vm866_vm3, %v2062_v49, 0.0 }
 0x172   : > { %v935_v21 = vadd.f32 %v934_v19, %v933_v33  ;;  %v1104_v19 = vadd.f32 %v1103_v40, %v1102_v25  ;;  %v1026_v33 = vmul.f32 %v2116_v12, %v2116_v12  ;;  %v1109_v27 = vsel %vm866_vm3, %v1025_v15, 0.0 }
 0x173   : > { %v946_v40 = vsel %vm866_vm3, %v2074_v55, 0.0 }
 0x174   : > { %v937_v13 = vadd.f32 %v936_v35, %v935_v21  ;;  %v1106_v35 = vadd.f32 %v1105_v9, %v1104_v19  ;;  %v1027_v21 = vmul.f32 %v2124_v16, %v2124_v16  ;;  %v1111_v5 = vsel %vm866_vm3, %v1026_v33, 0.0 }
 0x175   : > { %v948_v9 = vsel %vm866_vm3, %v2082_v59, 0.0 }
 0x176   : > { %v939_v17 = vadd.f32 %v938_v38, %v937_v13  ;;  %v1108_v38 = vadd.f32 %v1107_v29, %v1106_v35  ;;  %v1028_v13 = vmul.f32 %v2136_v22, %v2136_v22  ;;  %v1113_v15 = vsel %vm866_vm3, %v1027_v21, 0.0 }
 0x177   : > { %v950_v29 = vsel %vm866_vm3, %v2070_v53, 0.0 }
 0x178   : > { %v941_v31 = vadd.f32 %v940_v46, %v939_v17  ;;  %v1110_v46 = vadd.f32 %v1109_v27, %v1108_v38  ;;  %v1029_v17 = vmul.f32 %v2144_v26, %v2144_v26  ;;  %v1115_v33 = vsel %vm866_vm3, %v1028_v13, 0.0 }
 0x179   : > { %v952_v27 = vsel %vm866_vm3, %v2078_v57, 0.0 }
 0x17a   : > { %v943_v23 = vadd.f32 %v942_v42, %v941_v31  ;;  %v1112_v42 = vadd.f32 %v1111_v5, %v1110_v46  ;;  %v1030_v31 = vmul.f32 %v2132_v20, %v2132_v20  ;;  %v1117_v21 = vsel %vm866_vm3, %v1029_v17, 0.0 }
 0x17b   : > { %v954_v5 = vsel %vm866_vm3, %v2090_v63, 0.0  ;;  %v1050_v63 = vmul.f32 %v2086_v61, %v2086_v61 }
 0x17c   : > { %v945_v25 = vadd.f32 %v944_v36, %v943_v23  ;;  %v1114_v36 = vadd.f32 %v1113_v15, %v1112_v42  ;;  %v1031_v23 = vmul.f32 %v2140_v24, %v2140_v24  ;;  %v1119_v13 = vsel %vm866_vm3, %v1030_v31, 0.0 }
 0x17d   : > { %v956_v15 = vsel %vm866_vm3, %v2098_v3, 0.0  ;;  %v1047_v24 = vmul.f32 %v2078_v57, %v2078_v57  ;;  %v1049_v57 = vmul.f32 %v2098_v3, %v2098_v3  ;;  %v1051_v3 = vmul.f32 %v2094_v1, %v2094_v1 }
 0x17e   : > { %v947_v19 = vadd.f32 %v946_v40, %v945_v25  ;;  %v1116_v40 = vadd.f32 %v1115_v33, %v1114_v36  ;;  %v1032_v25 = vmul.f32 %v2152_v30, %v2152_v30  ;;  %v1121_v17 = vsel %vm866_vm3, %v1031_v23, 0.0 }
 0x17f   : > { %v958_v33 = vsel %vm866_vm3, %v2086_v61, 0.0  ;;  %v1045_v30 = vmul.f32 %v2082_v59, %v2082_v59 }
 0x180   : > { %v949_v35 = vadd.f32 %v948_v9, %v947_v19  ;;  %v1118_v9 = vadd.f32 %v1117_v21, %v1116_v40  ;;  %v1033_v19 = vmul.f32 %v2160_v34, %v2160_v34  ;;  %v1123_v31 = vsel %vm866_vm3, %v1032_v25, 0.0 }
 0x181   : > { %v960_v21 = vsel %vm866_vm3, %v2094_v1, 0.0  ;;  %v1043_v34 = vmul.f32 %v2062_v49, %v2062_v49 }
 0x182   : > { %v951_v38 = vadd.f32 %v950_v29, %v949_v35  ;;  %v1120_v29 = vadd.f32 %v1119_v13, %v1118_v9  ;;  %v1034_v35 = vmul.f32 %v2148_v28, %v2148_v28  ;;  %v1125_v23 = vsel %vm866_vm3, %v1033_v19, 0.0 }
 0x183   : > { %v962_v13 = vsel %vm866_vm3, %v2106_v7, 0.0  ;;  %v1041_v28 = vmul.f32 %v2066_v51, %v2066_v51 }
 0x184   : > { %v953_v46 = vadd.f32 %v952_v27, %v951_v38  ;;  %v1122_v27 = vadd.f32 %v1121_v17, %v1120_v29  ;;  %v1035_v38 = vmul.f32 %v2156_v32, %v2156_v32  ;;  %v1127_v25 = vsel %vm866_vm3, %v1034_v35, 0.0 }
 0x185   : > { %v964_v17 = vsel %vm866_vm3, %v2114_v11, 0.0  ;;  %v1039_v32 = vmul.f32 %v2046_v41, %v2046_v41 }
 0x186   : > { %v955_v42 = vadd.f32 %v954_v5, %v953_v46  ;;  %v1124_v5 = vadd.f32 %v1123_v31, %v1122_v27  ;;  %v1036_v46 = vmul.f32 %v2042_v39, %v2042_v39  ;;  %v1129_v19 = vsel %vm866_vm3, %v1035_v38, 0.0  ;;  %v2816_v31 = vld [vmem:[#allocation21_spill] sm:$0xff] }
 0x187   : > { %v1038_v27 = vmul.f32 %v2038_v37, %v2038_v37 }
 0x188   : > { %v957_v36 = vadd.f32 %v956_v15, %v955_v42  ;;  %v1126_v15 = vadd.f32 %v1125_v23, %v1124_v5  ;;  %v1037_v42 = vmul.f32 %v2050_v43, %v2050_v43  ;;  %v1131_v35 = vsel %vm866_vm3, %v1036_v46, 0.0 }
 0x189   : > { %v1135_v46 = vsel %vm866_vm3, %v1038_v27, 0.0  ;;  %v1139_v27 = vsel %vm866_vm3, %v1040_v0, 0.0  ;;  %v1143_v0 = vsel %vm866_vm3, %v1042_v60, 0.0  ;;  %v1147_v60 = vsel %vm866_vm3, %v1044_v2, 0.0 }
 0x18a   : > { %v959_v40 = vadd.f32 %v958_v33, %v957_v36  ;;  %v1128_v33 = vadd.f32 %v1127_v25, %v1126_v15  ;;  %v966_v36 = vsel %vm866_vm3, %v2816_v31, 0.0  ;;  %v1133_v38 = vsel %vm866_vm3, %v1037_v42, 0.0 }
 0x18b   : > { %v1137_v42 = vsel %vm866_vm3, %v1039_v32, 0.0  ;;  %v1141_v32 = vsel %vm866_vm3, %v1041_v28, 0.0  ;;  %v1145_v28 = vsel %vm866_vm3, %v1043_v34, 0.0  ;;  %v1149_v34 = vsel %vm866_vm3, %v1045_v30, 0.0 }
 0x18c   : > { %v961_v9 = vadd.f32 %v960_v21, %v959_v40  ;;  %v1130_v23 = vadd.f32 %v1129_v19, %v1128_v33  ;;  %v2817_v40 = vld [vmem:[#allocation22_spill] sm:$0xff]  ;;  %v1151_v2 = vsel %vm866_vm3, %v1046_v62, 0.0  ;;  %v1153_v30 = vsel %vm866_vm3, %v1047_v24, 0.0 }
 0x18d   : > { %v968_v5 = vsel %vm866_vm3, %v2817_v40, 0.0  ;;  %v1155_v62 = vsel %vm866_vm3, %v1048_v56, 0.0  ;;  %v1157_v24 = vsel %vm866_vm3, %v1049_v57, 0.0  ;;  %v1053_v56 = vmul.f32 %v2114_v11, %v2114_v11 }
 0x18e   : > { %v963_v29 = vadd.f32 %v962_v13, %v961_v9  ;;  %v1132_v25 = vadd.f32 %v1131_v35, %v1130_v23  ;;  %v2818_v9 = vld [vmem:[#allocation24_spill] sm:$0xff] }
 0x18f   : > { %v970_v15 = vsel %vm866_vm3, %v2818_v9, 0.0 }
 0x190   : > { %v965_v21 = vadd.f32 %v964_v17, %v963_v29  ;;  %v1134_v19 = vadd.f32 %v1133_v38, %v1132_v25  ;;  %v2819_v29 = vld [vmem:[#allocation26_spill] sm:$0xff] }
 0x191   : > { %v972_v33 = vsel %vm866_vm3, %v2819_v29, 0.0 }
 0x192   : > { %v967_v13 = vadd.f32 %v966_v36, %v965_v21  ;;  %v1136_v35 = vadd.f32 %v1135_v46, %v1134_v19  ;;  %v2820_v21 = vld [vmem:[#allocation23_spill] sm:$0xff] }
 0x193   : > { %v974_v23 = vsel %vm866_vm3, %v2820_v21, 0.0 }
 0x194   : > { %v969_v17 = vadd.f32 %v968_v5, %v967_v13  ;;  %v1138_v38 = vadd.f32 %v1137_v42, %v1136_v35  ;;  %v2821_v13 = vld [vmem:[#allocation25_spill] sm:$0xff] }
 0x195   : > { %v976_v25 = vsel %vm866_vm3, %v2821_v13, 0.0 }
 0x196   : > { %v971_v36 = vadd.f32 %v970_v15, %v969_v17  ;;  %v1140_v46 = vadd.f32 %v1139_v27, %v1138_v38  ;;  %v2822_v17 = vld [vmem:[#allocation28_spill] sm:$0xff] }
 0x197   : > { %v978_v19 = vsel %vm866_vm3, %v2822_v17, 0.0 }
 0x198   : > { %v973_v5 = vadd.f32 %v972_v33, %v971_v36  ;;  %v1142_v42 = vadd.f32 %v1141_v32, %v1140_v46  ;;  %v2823_v36 = vld [vmem:[#allocation31_spill] sm:$0xff] }
 0x199   : > { %v980_v35 = vsel %vm866_vm3, %v2823_v36, 0.0 }
 0x19a   : > { %v975_v15 = vadd.f32 %v974_v23, %v973_v5  ;;  %v1144_v27 = vadd.f32 %v1143_v0, %v1142_v42  ;;  %v2824_v5 = vld [vmem:[#allocation27_spill] sm:$0xff] }
 0x19b   : > { %v982_v38 = vsel %vm866_vm3, %v2824_v5, 0.0 }
 0x19c   : > { %v977_v33 = vadd.f32 %v976_v25, %v975_v15  ;;  %v1146_v32 = vadd.f32 %v1145_v28, %v1144_v27  ;;  %v2825_v15 = vld [vmem:[#allocation30_spill] sm:$0xff] }
 0x19d   : > { %v984_v46 = vsel %vm866_vm3, %v2825_v15, 0.0 }
 0x19e   : > { %v979_v23 = vadd.f32 %v978_v19, %v977_v33  ;;  %v1148_v0 = vadd.f32 %v1147_v60, %v1146_v32  ;;  %v2826_v33 = vld [vmem:[#allocation35_spill] sm:$0xff] }
 0x19f   : > { %v986_v42 = vsel %vm866_vm3, %v2826_v33, 0.0 }
 0x1a0   : > { %v981_v25 = vadd.f32 %v980_v35, %v979_v23  ;;  %v1150_v28 = vadd.f32 %v1149_v34, %v1148_v0  ;;  %v2827_v23 = vld [vmem:[#allocation39_spill] sm:$0xff] }
 0x1a1   : > { %v988_v27 = vsel %vm866_vm3, %v2827_v23, 0.0 }
 0x1a2   : > { %v983_v19 = vadd.f32 %v982_v38, %v981_v25  ;;  %v1152_v60 = vadd.f32 %v1151_v2, %v1150_v28  ;;  %v2828_v25 = vld [vmem:[#allocation33_spill] sm:$0xff]  ;;  %v1159_v28 = vsel %vm866_vm3, %v1050_v63, 0.0  ;;  %v1165_v63 = vsel %vm866_vm3, %v1053_v56, 0.0 }
 0x1a3   : > { %v990_v32 = vsel %vm866_vm3, %v2828_v25, 0.0 }
 0x1a4   : > { %v985_v35 = vadd.f32 %v984_v46, %v983_v19  ;;  %v1154_v34 = vadd.f32 %v1153_v30, %v1152_v60  ;;  %v2829_v19 = vld [vmem:[#allocation37_spill] sm:$0xff]  ;;  %v1054_v60 = vmul.f32 %v2816_v31, %v2816_v31  ;;  %v1057_v31 = vmul.f32 %v2819_v29, %v2819_v29 }
 0x1a5   : > { %v992_v0 = vsel %vm866_vm3, %v2829_v19, 0.0 }
 0x1a6   : > { %v987_v38 = vadd.f32 %v986_v42, %v985_v35  ;;  %v1156_v2 = vadd.f32 %v1155_v62, %v1154_v34  ;;  %v1052_v35 = vmul.f32 %v2106_v7, %v2106_v7 }
 0x1a8   : > { %v989_v46 = vadd.f32 %v988_v27, %v987_v38  ;;  %v1158_v53 = vadd.f32 %v1157_v24, %v1156_v2  ;;  %v1161_v27 = vsel %vm866_vm3, %v1051_v3, 0.0  ;;  %v1163_v57 = vsel %vm866_vm3, %v1052_v35, 0.0 }
 0x1a9   : > { %v1056_v24 = vmul.f32 %v2818_v9, %v2818_v9  ;;  %v1167_v3 = vsel %vm866_vm3, %v1054_v60, 0.0  ;;  %v1059_v9 = vmul.f32 %v2821_v13, %v2821_v13  ;;  %v1062_v13 = vmul.f32 %v2824_v5, %v2824_v5 }
 0x1aa   : > { %v991_v42 = vadd.f32 %v990_v32, %v989_v46  ;;  %v1160_v38 = vadd.f32 %v1159_v28, %v1158_v53  ;;  %v1055_v46 = vmul.f32 %v2817_v40, %v2817_v40  ;;  %v865_v28 = vld [vmem:[#allocation2] sm:$0x1]  ;;  %v1058_v40 = vmul.f32 %v2820_v21, %v2820_v21 }
 0x1ab   : > { %v1171_v56 = vsel %vm866_vm3, %v1056_v24, 0.0 }
 0x1ac   : > { %v993_v61 = vadd.f32 %v992_v0, %v991_v42  ;;  %v1162_v62 = vadd.f32 %v1161_v27, %v1160_v38  ;;  %v1173_v38 = vsel %vm866_vm3, %v1057_v31, 0.0  ;;  %v1065_v31 = vmul.f32 %v2827_v23, %v2827_v23 }
 0x1ae   : > { %v994_v30 = vrot.slane %v993_v61, 4  ;;  %v1164_v0 = vadd.f32 %v1163_v57, %v1162_v62  ;;  %v1060_v57 = vmul.f32 %v2822_v17, %v2822_v17  ;;  %v1061_v62 = vmul.f32 %v2823_v36, %v2823_v36 }
 0x1af   : > { %v1063_v17 = vmul.f32 %v2825_v15, %v2825_v15  ;;  %v1183_v36 = vsel %vm866_vm3, %v1062_v13, 0.0 }
 0x1b0   : > { %v995_v32 = vadd.f32 %v994_v30, %v993_v61  ;;  %v1166_v42 = vadd.f32 %v1165_v63, %v1164_v0  ;;  %v1169_v61 = vsel %vm866_vm3, %v1055_v46, 0.0  ;;  %v1177_v46 = vsel %vm866_vm3, %v1059_v9, 0.0 }
 0x1b1   : > { %v1181_v24 = vsel %vm866_vm3, %v1061_v62, 0.0  ;;  %v1185_v5 = vsel %vm866_vm3, %v1063_v17, 0.0 }
 0x1b2   : > { %v996_v34 = vrot.slane %v995_v32, 2  ;;  %v1168_v35 = vadd.f32 %v1167_v3, %v1166_v42 }
 0x1b4   : > { %v997_v53 = vadd.f32 %v996_v34, %v995_v32  ;;  %v1170_v30 = vadd.f32 %v1169_v61, %v1168_v35  ;;  %v1175_v32 = vsel %vm866_vm3, %v1058_v40, 0.0  ;;  %v1179_v34 = vsel %vm866_vm3, %v1060_v57, 0.0 }
 0x1b6   : > { %v998_v2 = vrot.slane %v997_v53, 1  ;;  %v1172_v29 = vadd.f32 %v1171_v56, %v1170_v30 }
 0x1b8   : > { %v999_v27 = vadd.f32 %v998_v2, %v997_v53  ;;  %v1174_v21 = vadd.f32 %v1173_v38, %v1172_v29  ;;  %v1064_v53 = vmul.f32 %v2826_v33, %v2826_v33  ;;  %v1066_v2 = vmul.f32 %v2828_v25, %v2828_v25 }
 0x1b9   : > { %v1189_v33 = vsel %vm866_vm3, %v1065_v31, 0.0 }
 0x1ba   : > { %v1000_v60 = vadd.f32 %v999_v27, %v865_v28  ;;  %v1176_v63 = vadd.f32 %v1175_v32, %v1174_v21  ;;  %v1187_v15 = vsel %vm866_vm3, %v1064_v53, 0.0  ;;  %v1067_v28 = vmul.f32 %v2829_v19, %v2829_v19  ;;  %v1003_v32 = vld [vmem:[#allocation3] sm:$0x1] }
 0x1bb   : > { %v1191_v56 = vsel %vm866_vm3, %v1066_v2, 0.0 }
 0x1bc   : > { %1002 = vst.msk [vmem:[#allocation2] sm:$0x1] %vm1001_vm4, %v1000_v60  ;;  %v1178_v0 = vadd.f32 %v1177_v46, %v1176_v63  ;;  %v1193_v23 = vsel %vm866_vm3, %v1067_v28, 0.0 }
 0x1be   : > { %v1180_v3 = vadd.f32 %v1179_v34, %v1178_v0 }
 0x1c0   : > { %v1182_v42 = vadd.f32 %v1181_v24, %v1180_v3 }
 0x1c2   : > { %v1184_v61 = vadd.f32 %v1183_v36, %v1182_v42 }
 0x1c4   : > { %v1186_v35 = vadd.f32 %v1185_v5, %v1184_v61 }
 0x1c6   : > { %v1188_v40 = vadd.f32 %v1187_v15, %v1186_v35 }
 0x1c8   : > { %v1190_v27 = vadd.f32 %v1189_v33, %v1188_v40 }
 0x1ca   : > { %v1192_v30 = vadd.f32 %v1191_v56, %v1190_v27 }
 0x1cc   : > { %v1194_v9 = vadd.f32 %v1193_v23, %v1192_v30 }
 0x1ce   : > { %v1195_v38 = vrot.slane %v1194_v9, 4 }
 0x1d0   : > { %v1196_v60 = vadd.f32 %v1195_v38, %v1194_v9 }
 0x1d2   : > { %v1197_v29 = vrot.slane %v1196_v60, 2 }
 0x1d4   : > { %v1198_v25 = vadd.f32 %v1197_v29, %v1196_v60 }
 0x1d6   : > { %v1199_v57 = vrot.slane %v1198_v25, 1 }
 0x1d8   : > { %v1200_v21 = vadd.f32 %v1199_v57, %v1198_v25 }
 0x1da   : > { %v1201_v62 = vadd.f32 %v1200_v21, %v1003_v32 }
 0x1dc   : > { %1202 = vst.msk [vmem:[#allocation3] sm:$0x1] %vm1001_vm4, %v1201_v62 }
 0x1dd PF: > { %p1203_p11 = scmp.eq.s32.totalorder %s1868_s16, 1 }
 0x1df   : > { %p1204_p12 = pnand %p1203_p11, %p854_p8 }
 0x1e0   : > { %v1208_v19 = vld [vmem:[#allocation2] sm:$0x1] (!%p1204_p12)  ;;  %vm1218_vm5 = vcmask (!%p1204_p12), 57344  }
 0x1e1   : > { %1207 = sbr.rel (%p1204_p12) target bundleno = 508 (0x1fc), region = 48  ;;  %v1209_v63 = vmul.f32 (!%p1204_p12), 0.0009765625, %v1208_v19  ;;  %v1216_v24 = vld [vmem:[%s2744_s2] sm:$0x1] (!%p1204_p12) }
 0x1e2   : > { %v1220_v36 = vld [vmem:[%s2745_s3] sm:$0x1] (!%p1204_p12) }
 0x1e3   : > { %v1210_v46 = vld [vmem:[#allocation3] sm:$0x1] (!%p1204_p12)  ;;  %v1212_v34 = vmul.f32 (!%p1204_p12), %v1209_v63, %v1209_v63 }
 0x1e4   : > { %v1211_v13 = vmul.f32 (!%p1204_p12), 0.0009765625, %v1210_v46 }
 0x1e6   : > { %v1213_v0 = vsub.f32 (!%p1204_p12), %v1211_v13, %v1212_v34 }
 0x1e8   : > { %v1214_v17 = vadd.f32 1e-05, %v1213_v0 }
 0x1ea   : > { %1840 = vrsqrt.f32 %v1214_v17 }
 0x1f4   : > { %v1841_v3 = vpop.eup %1840 }
 0x1f5   : > { %v1217_v53 = vmul.f32 %v1841_v3, %v1216_v24 }
 0x1f7   : > { %1219 = vst.msk [vmem:[#allocation4] sm:$0x1] %vm1218_vm5, %v1217_v53  ;;  %v1221_v42 = vmul.f32 %v1217_v53, %v1209_v63 }
 0x1f9   : > { %v1222_v31 = vsub.f32 %v1220_v36, %v1221_v42 }
 0x1fb   : > { %1223 = vst.msk [vmem:[#allocation5] sm:$0x1] %vm1218_vm5, %v1222_v31 }
 0x1fc PF: > { %p1646_p13 = scmp.ne.s32.totalorder %s1868_s16, 1 }
 0x1fd   : > { %vm1481_vm6 = vcmask (!%p1646_p13), 64512   ;;  %v2830_v2 = vld [vmem:[#allocation7_spill] sm:$0xff] (!%p1646_p13)  ;;  %v2831_v40 = vld [vmem:[#allocation9_spill] sm:$0xff] (!%p1646_p13)  ;;  %v2832_v13 = vld [vmem:[#allocation6_spill] sm:$0xff] (!%p1646_p13) }
 0x1fe   : > { %1226 = sbr.rel (%p1646_p13) target bundleno = 578 (0x242), region = 52  ;;  %v2499_v5 = vld [vmem:[#allocation4] ss:$0 sm:$0xff] (!%p1646_p13) }
 0x1ff   : > { %v1234_v15 = vmul.f32 (!%p1646_p13), %v2499_v5, %v2830_v2  ;;  %v1250_v35 = vmul.f32 (!%p1646_p13), %v2499_v5, %v2104_v6  ;;  %v1266_v28 = vmul.f32 (!%p1646_p13), %v2499_v5, %v2042_v39  ;;  %v1282_v33 = vmul.f32 (!%p1646_p13), %v2499_v5, %v2106_v7  ;;  %v2833_v53 = vld [vmem:[#allocation21_spill] sm:$0xff] (!%p1646_p13) }
 0x200   : > { %v1235_v56 = vmul.f32 (!%p1646_p13), %v2499_v5, %v2831_v40  ;;  %v1251_v27 = vmul.f32 (!%p1646_p13), %v2499_v5, %v2112_v10  ;;  %v1267_v23 = vmul.f32 (!%p1646_p13), %v2499_v5, %v2050_v43  ;;  %v1283_v30 = vmul.f32 (!%p1646_p13), %v2499_v5, %v2114_v11 }
 0x201   : > { %v1236_v34 = vmul.f32 (!%p1646_p13), %v2832_v13, %v2499_v5  ;;  %v1252_v0 = vmul.f32 (!%p1646_p13), %v2100_v4, %v2499_v5  ;;  %v1268_v3 = vmul.f32 (!%p1646_p13), %v2038_v37, %v2499_v5  ;;  %v1284_v36 = vmul.f32 (!%p1646_p13), %v2833_v53, %v2499_v5 }
 0x202   : > { %v2501_v61 = vld [vmem:[#allocation5] ss:$0 sm:$0xff] (!%p1646_p13)  ;;  %v1253_v40 = vmul.f32 (!%p1646_p13), %v2108_v8, %v2499_v5  ;;  %v1255_v53 = vmul.f32 (!%p1646_p13), %v2499_v5, %v2128_v18 }
 0x203   : > { %v1305_v6 = vadd.f32 (!%p1646_p13), %v2501_v61, %v1234_v15  ;;  %v1321_v9 = vadd.f32 (!%p1646_p13), %v2501_v61, %v1250_v35  ;;  %v1337_v39 = vadd.f32 (!%p1646_p13), %v2501_v61, %v1266_v28  ;;  %v1353_v7 = vadd.f32 (!%p1646_p13), %v2501_v61, %v1282_v33  ;;  %v2834_v15 = vld [vmem:[#allocation8_spill] sm:$0xff] (!%p1646_p13) }
 0x204   : > { %v1306_v38 = vadd.f32 (!%p1646_p13), %v2501_v61, %v1235_v56  ;;  %v1322_v60 = vadd.f32 (!%p1646_p13), %v2501_v61, %v1251_v27  ;;  %v1338_v10 = vadd.f32 (!%p1646_p13), %v2501_v61, %v1267_v23  ;;  %v1354_v29 = vadd.f32 (!%p1646_p13), %v2501_v61, %v1283_v30  ;;  %v2835_v23 = vld [vmem:[#allocation22_spill] sm:$0xff] (!%p1646_p13) }
 0x205   : > { %v1369_v43 = vmax.f32 %v1305_v6, 0.0  ;;  %v1385_v25 = vmax.f32 %v1321_v9, 0.0  ;;  %v1401_v57 = vmax.f32 %v1337_v39, 0.0  ;;  %v1417_v11 = vmax.f32 %v1353_v7, 0.0 }
 0x206   : > { %v1370_v32 = vmax.f32 %v1306_v38, 0.0  ;;  %v1386_v21 = vmax.f32 %v1322_v60, 0.0  ;;  %v1402_v62 = vmax.f32 %v1338_v10, 0.0  ;;  %v1418_v19 = vmax.f32 %v1354_v29, 0.0  ;;  %v2836_v10 = vld [vmem:[#allocation10_spill] sm:$0xff] }
 0x207   : > { %v1433_v46 = vmax.f32 %v1369_v43, %v1385_v25  ;;  %v1449_v63 = vmax.f32 %v1401_v57, %v1417_v11  ;;  %v1307_v31 = vadd.f32 %v2501_v61, %v1236_v34  ;;  %v1323_v2 = vadd.f32 %v2501_v61, %v1252_v0 }
 0x208   : > { %v1434_v17 = vmax.f32 %v1370_v32, %v1386_v21  ;;  %v1450_v24 = vmax.f32 %v1402_v62, %v1418_v19  ;;  %v1237_v35 = vmul.f32 %v2834_v15, %v2499_v5  ;;  %v1339_v4 = vadd.f32 %v2501_v61, %v1268_v3  ;;  %v2837_v62 = vld [vmem:[#allocation24_spill] sm:$0xff]  ;;  %v2838_v15 = vld [vmem:[#allocation26_spill] sm:$0xff] }
 0x209   : > { %v1465_v42 = vmax.f32 %v1433_v46, %v1449_v63  ;;  %v1355_v33 = vadd.f32 %v2501_v61, %v1284_v36  ;;  %v1371_v37 = vmax.f32 %v1307_v31, 0.0  ;;  %v1387_v56 = vmax.f32 %v1323_v2, 0.0 }
 0x20a   : > { %v1466_v28 = vmax.f32 %v1434_v17, %v1450_v24  ;;  %v1269_v27 = vmul.f32 %v2046_v41, %v2499_v5  ;;  %v1285_v30 = vmul.f32 %v2835_v23, %v2499_v5  ;;  %v1403_v6 = vmax.f32 %v1339_v4, 0.0 }
 0x20b   : > { %1482 = vst.msk [vmem:[%s1957_s8] sm:$0xff] %vm1481_vm6, %v1465_v42  ;;  %v1419_v9 = vmax.f32 %v1355_v33, 0.0  ;;  %v1308_v39 = vadd.f32 %v2501_v61, %v1237_v35  ;;  %v1324_v7 = vadd.f32 %v2501_v61, %v1253_v40  ;;  %v1435_v38 = vmax.f32 %v1371_v37, %v1387_v56 }
 0x20c   : > { %1483 = vst.msk [vmem:[%s1957_s8 + $0x8] sm:$0xff] %vm1481_vm6, %v1466_v28  ;;  %v1340_v8 = vadd.f32 %v2501_v61, %v1269_v27  ;;  %v1356_v60 = vadd.f32 %v2501_v61, %v1285_v30  ;;  %v1238_v29 = vmul.f32 %v2499_v5, %v2836_v10  ;;  %v1254_v57 = vmul.f32 %v2499_v5, %v2120_v14 }
 0x20d   : > { %v1451_v41 = vmax.f32 %v1403_v6, %v1419_v9  ;;  %v1372_v43 = vmax.f32 %v1308_v39, 0.0  ;;  %v1388_v25 = vmax.f32 %v1324_v7, 0.0  ;;  %v1270_v21 = vmul.f32 %v2499_v5, %v2058_v47  ;;  %v2839_v39 = vld [vmem:[#allocation23_spill] sm:$0xff] }
 0x20e   : > { %v1404_v11 = vmax.f32 %v1340_v8, 0.0  ;;  %v1420_v32 = vmax.f32 %v1356_v60, 0.0  ;;  %v1286_v19 = vmul.f32 %v2499_v5, %v2837_v62  ;;  %v1309_v13 = vadd.f32 %v2501_v61, %v1238_v29 }
 0x20f   : > { %v1467_v46 = vmax.f32 %v1435_v38, %v1451_v41  ;;  %v1436_v63 = vmax.f32 %v1372_v43, %v1388_v25  ;;  %v1325_v34 = vadd.f32 %v2501_v61, %v1254_v57  ;;  %v1341_v17 = vadd.f32 %v2501_v61, %v1270_v21 }
 0x210   : > { %v1452_v0 = vmax.f32 %v1404_v11, %v1420_v32  ;;  %v1357_v14 = vadd.f32 %v2501_v61, %v1286_v19  ;;  %v1239_v24 = vmul.f32 %v2499_v5, %v2064_v50  ;;  %v1373_v47 = vmax.f32 %v1309_v13, 0.0  ;;  %v2840_v11 = vld [vmem:[#allocation25_spill] sm:$0xff] }
 0x211   : > { %1484 = vst.msk [vmem:[%s1957_s8 + $0x10] sm:$0xff] %vm1481_vm6, %v1467_v46  ;;  %v1389_v3 = vmax.f32 %v1325_v34, 0.0  ;;  %v1271_v36 = vmul.f32 %v2499_v5, %v2066_v51  ;;  %v1405_v31 = vmax.f32 %v1341_v17, 0.0  ;;  %v1287_v35 = vmul.f32 %v2499_v5, %v2838_v15 }
 0x212   : > { %v1468_v42 = vmax.f32 %v1436_v63, %v1452_v0  ;;  %v1421_v2 = vmax.f32 %v1357_v14, 0.0  ;;  %v1310_v4 = vadd.f32 %v2501_v61, %v1239_v24  ;;  %v1326_v50 = vadd.f32 %v2501_v61, %v1255_v53 }
 0x213   : > { %v1437_v28 = vmax.f32 %v1373_v47, %v1389_v3  ;;  %v1342_v33 = vadd.f32 %v2501_v61, %v1271_v36  ;;  %v1358_v18 = vadd.f32 %v2501_v61, %v1287_v35  ;;  %v1240_v51 = vmul.f32 %v2052_v44, %v2499_v5  ;;  %v2841_v3 = vld [vmem:[#allocation28_spill] sm:$0xff] }
 0x214   : > { %1485 = vst.msk [vmem:[%s1957_s8 + $0x18] sm:$0xff] %vm1481_vm6, %v1468_v42  ;;  %v1453_v40 = vmax.f32 %v1405_v31, %v1421_v2  ;;  %v1256_v37 = vmul.f32 %v2116_v12, %v2499_v5  ;;  %v1374_v56 = vmax.f32 %v1310_v4, 0.0  ;;  %v1390_v27 = vmax.f32 %v1326_v50, 0.0 }
 0x215   : > { %v1406_v23 = vmax.f32 %v1342_v33, 0.0  ;;  %v1272_v30 = vmul.f32 %v2054_v45, %v2499_v5  ;;  %v1422_v9 = vmax.f32 %v1358_v18, 0.0  ;;  %v1288_v7 = vmul.f32 %v2839_v39, %v2499_v5 }
 0x216   : > { %v1469_v6 = vmax.f32 %v1437_v28, %v1453_v40  ;;  %v1311_v38 = vadd.f32 %v2501_v61, %v1240_v51  ;;  %v1438_v8 = vmax.f32 %v1374_v56, %v1390_v27  ;;  %v1327_v60 = vadd.f32 %v2501_v61, %v1256_v37  ;;  %v2842_v51 = vld [vmem:[#allocation31_spill] sm:$0xff] }
 0x217   : > { %v1343_v44 = vadd.f32 %v2501_v61, %v1272_v30  ;;  %v1241_v12 = vmul.f32 %v2060_v48, %v2499_v5  ;;  %v1454_v10 = vmax.f32 %v1406_v23, %v1422_v9  ;;  %v1359_v45 = vadd.f32 %v2501_v61, %v1288_v7 }
 0x218   : > { %1486 = vst.msk [vmem:[%s1957_s8 + $0x20] sm:$0xff] %vm1481_vm6, %v1469_v6  ;;  %v1375_v29 = vmax.f32 %v1311_v38, 0.0  ;;  %v1257_v41 = vmul.f32 %v2124_v16, %v2499_v5  ;;  %v1391_v43 = vmax.f32 %v1327_v60, 0.0  ;;  %v1273_v57 = vmul.f32 %v2062_v49, %v2499_v5  ;;  %v2843_v38 = vld [vmem:[#allocation11_spill] sm:$0xff] }
 0x219   : > { %v1407_v25 = vmax.f32 %v1343_v44, 0.0  ;;  %v1289_v32 = vmul.f32 %v2840_v11, %v2499_v5  ;;  %v1470_v21 = vmax.f32 %v1438_v8, %v1454_v10  ;;  %v1423_v48 = vmax.f32 %v1359_v45, 0.0 }
 0x21a   : > { %v1312_v62 = vadd.f32 %v2501_v61, %v1241_v12  ;;  %v1328_v19 = vadd.f32 %v2501_v61, %v1257_v41  ;;  %v1439_v46 = vmax.f32 %v1375_v29, %v1391_v43  ;;  %v1344_v63 = vadd.f32 %v2501_v61, %v1273_v57  ;;  %v2844_v12 = vld [vmem:[#allocation27_spill] sm:$0xff] }
 0x21b   : > { %v1360_v13 = vadd.f32 %v2501_v61, %v1289_v32  ;;  %v1242_v16 = vmul.f32 %v2499_v5, %v2072_v54  ;;  %1487 = vst.msk [vmem:[%s1957_s8 + $0x28] sm:$0xff] %vm1481_vm6, %v1470_v21  ;;  %v1455_v49 = vmax.f32 %v1407_v25, %v1423_v48  ;;  %v1258_v17 = vmul.f32 %v2499_v5, %v2136_v22  ;;  %v2846_v32 = vld [vmem:[#allocation29_spill] sm:$0xff] }
 0x21c   : > { %v1376_v34 = vmax.f32 %v1312_v62, 0.0  ;;  %v1392_v0 = vmax.f32 %v1328_v19, 0.0  ;;  %v1408_v14 = vmax.f32 %v1344_v63, 0.0  ;;  %v1274_v47 = vmul.f32 %v2499_v5, %v2074_v55  ;;  %v2847_v19 = vld [vmem:[#allocation13_spill] sm:$0xff]  ;;  %v2848_v63 = vld [vmem:[#allocation30_spill] sm:$0xff] }
 0x21d   : > { %v1424_v24 = vmax.f32 %v1360_v13, 0.0  ;;  %v1290_v53 = vmul.f32 %v2499_v5, %v2841_v3  ;;  %v1471_v36 = vmax.f32 %v1439_v46, %v1455_v49  ;;  %v1313_v54 = vadd.f32 %v2501_v61, %v1242_v16 }
 0x21e   : > { %v1440_v42 = vmax.f32 %v1376_v34, %v1392_v0  ;;  %v1329_v31 = vadd.f32 %v2501_v61, %v1258_v17  ;;  %v1345_v15 = vadd.f32 %v2501_v61, %v1274_v47  ;;  %v1243_v35 = vmul.f32 %v2499_v5, %v2080_v58  ;;  %v2849_v47 = vld [vmem:[#allocation16_spill] sm:$0xff] }
 0x21f   : > { %v1456_v2 = vmax.f32 %v1408_v14, %v1424_v24  ;;  %v1361_v22 = vadd.f32 %v2501_v61, %v1290_v53  ;;  %1488 = vst.msk [vmem:[%s1957_s8 + $0x30] sm:$0xff] %vm1481_vm6, %v1471_v36  ;;  %v1377_v55 = vmax.f32 %v1313_v54, 0.0  ;;  %v1259_v4 = vmul.f32 %v2499_v5, %v2144_v26  ;;  %v2850_v54 = vld [vmem:[#allocation34_spill] sm:$0xff] }
 0x220   : > { %v1393_v28 = vmax.f32 %v1329_v31, 0.0  ;;  %v1275_v50 = vmul.f32 %v2499_v5, %v2082_v59  ;;  %v1409_v40 = vmax.f32 %v1345_v15, 0.0  ;;  %v1291_v37 = vmul.f32 %v2499_v5, %v2842_v51 }
 0x221   : > { %v1472_v33 = vmax.f32 %v1440_v42, %v1456_v2  ;;  %v1425_v18 = vmax.f32 %v1361_v22, 0.0  ;;  %v1314_v27 = vadd.f32 %v2501_v61, %v1243_v35  ;;  %v1330_v58 = vadd.f32 %v2501_v61, %v1259_v4  ;;  %v2851_v22 = vld [vmem:[#allocation17_spill] sm:$0xff] }
 0x222   : > { %v1441_v56 = vmax.f32 %v1377_v55, %v1393_v28  ;;  %v1346_v23 = vadd.f32 %v2501_v61, %v1275_v50  ;;  %v1362_v26 = vadd.f32 %v2501_v61, %v1291_v37  ;;  %v1244_v59 = vmul.f32 %v2068_v52, %v2499_v5  ;;  %v2852_v55 = vld [vmem:[#allocation35_spill] sm:$0xff] }
 0x223   : > { %1489 = vst.msk [vmem:[%s1957_s8 + $0x38] sm:$0xff] %vm1481_vm6, %v1472_v33  ;;  %v1457_v30 = vmax.f32 %v1409_v40, %v1425_v18  ;;  %v1260_v6 = vmul.f32 %v2132_v20, %v2499_v5  ;;  %v1378_v9 = vmax.f32 %v1314_v27, 0.0  ;;  %v1394_v39 = vmax.f32 %v1330_v58, 0.0  ;;  %v2845_v20 = vld [vmem:[#allocation12_spill] sm:$0xff] }
 0x224   : > { %v1410_v7 = vmax.f32 %v1346_v23, 0.0  ;;  %v1276_v8 = vmul.f32 %v2843_v38, %v2499_v5  ;;  %v1426_v44 = vmax.f32 %v1362_v26, 0.0  ;;  %v1292_v10 = vmul.f32 %v2844_v12, %v2499_v5  ;;  %v2856_v38 = vld [vmem:[#allocation39_spill] sm:$0xff] }
 0x225   : > { %v1473_v60 = vmax.f32 %v1441_v56, %v1457_v30  ;;  %v1315_v45 = vadd.f32 %v2501_v61, %v1244_v59  ;;  %v1442_v29 = vmax.f32 %v1378_v9, %v1394_v39  ;;  %v1331_v41 = vadd.f32 %v2501_v61, %v1260_v6  ;;  %v2853_v56 = vld [vmem:[#allocation19_spill] sm:$0xff]  ;;  %v2854_v30 = vld [vmem:[#allocation38_spill] sm:$0xff]  ;;  %v2855_v59 = vld [vmem:[#allocation20_spill] sm:$0xff] }
 0x226   : > { %v1347_v52 = vadd.f32 %v2501_v61, %v1276_v8  ;;  %v1245_v43 = vmul.f32 %v2845_v20, %v2499_v5  ;;  %v1458_v25 = vmax.f32 %v1410_v7, %v1426_v44  ;;  %v1363_v57 = vadd.f32 %v2501_v61, %v1292_v10  ;;  %v2858_v20 = vld [vmem:[#allocation32_spill] sm:$0xff] }
 0x227   : > { %1490 = vst.msk [vmem:[%s1957_s8 + $0x40] sm:$0xff] %vm1481_vm6, %v1473_v60  ;;  %v1379_v11 = vmax.f32 %v1315_v45, 0.0  ;;  %v1261_v21 = vmul.f32 %v2846_v32, %v2499_v5  ;;  %v1395_v48 = vmax.f32 %v1331_v41, 0.0  ;;  %v1277_v46 = vmul.f32 %v2847_v19, %v2499_v5  ;;  %v2857_v41 = vld [vmem:[#allocation14_spill] sm:$0xff]  ;;  %v2859_v32 = vld [vmem:[#allocation15_spill] sm:$0xff]  ;;  %v2860_v19 = vld [vmem:[#allocation33_spill] sm:$0xff] }
 0x228   : > { %v1411_v62 = vmax.f32 %v1347_v52, 0.0  ;;  %v1293_v13 = vmul.f32 %v2848_v63, %v2499_v5  ;;  %v1474_v16 = vmax.f32 %v1442_v29, %v1458_v25  ;;  %v1427_v49 = vmax.f32 %v1363_v57, 0.0 }
 0x229   : > { %v1316_v34 = vadd.f32 %v2501_v61, %v1245_v43  ;;  %v1332_v0 = vadd.f32 %v2501_v61, %v1261_v21  ;;  %v1443_v17 = vmax.f32 %v1379_v11, %v1395_v48  ;;  %v1348_v14 = vadd.f32 %v2501_v61, %v1277_v46 }
 0x22a   : > { %v1364_v24 = vadd.f32 %v2501_v61, %v1293_v13  ;;  %v1246_v3 = vmul.f32 %v2499_v5, %v2849_v47  ;;  %1491 = vst.msk [vmem:[%s1957_s8 + $0x48] sm:$0xff] %vm1481_vm6, %v1474_v16  ;;  %v1459_v53 = vmax.f32 %v1411_v62, %v1427_v49  ;;  %v1262_v31 = vmul.f32 %v2499_v5, %v2850_v54  ;;  %v2862_v47 = vld [vmem:[#allocation36_spill] sm:$0xff]  ;;  %v2863_v54 = vld [vmem:[#allocation37_spill] sm:$0xff] }
 0x22b   : > { %v1380_v36 = vmax.f32 %v1316_v34, 0.0  ;;  %v1396_v42 = vmax.f32 %v1332_v0, 0.0  ;;  %v1412_v2 = vmax.f32 %v1348_v14, 0.0  ;;  %v1278_v35 = vmul.f32 %v2499_v5, %v2851_v22  ;;  %v2861_v34 = vld [vmem:[#allocation18_spill] sm:$0xff] }
 0x22c   : > { %v1428_v15 = vmax.f32 %v1364_v24, 0.0  ;;  %v1294_v28 = vmul.f32 %v2499_v5, %v2852_v55  ;;  %v1475_v4 = vmax.f32 %v1443_v17, %v1459_v53  ;;  %v1317_v33 = vadd.f32 %v2501_v61, %v1246_v3 }
 0x22d   : > { %v1444_v50 = vmax.f32 %v1380_v36, %v1396_v42  ;;  %v1333_v40 = vadd.f32 %v2501_v61, %v1262_v31  ;;  %v1349_v51 = vadd.f32 %v2501_v61, %v1278_v35  ;;  %v1247_v27 = vmul.f32 %v2499_v5, %v2853_v56 }
 0x22e   : > { %v1460_v18 = vmax.f32 %v1412_v2, %v1428_v15  ;;  %v1365_v37 = vadd.f32 %v2501_v61, %v1294_v28  ;;  %1492 = vst.msk [vmem:[%s1957_s8 + $0x50] sm:$0xff] %vm1481_vm6, %v1475_v4  ;;  %v1381_v58 = vmax.f32 %v1317_v33, 0.0  ;;  %v1263_v26 = vmul.f32 %v2499_v5, %v2854_v30 }
 0x22f   : > { %v1397_v23 = vmax.f32 %v1333_v40, 0.0  ;;  %v1279_v6 = vmul.f32 %v2499_v5, %v2855_v59  ;;  %v1413_v39 = vmax.f32 %v1349_v51, 0.0  ;;  %v1295_v8 = vmul.f32 %v2499_v5, %v2856_v38 }
 0x230   : > { %v1476_v9 = vmax.f32 %v1444_v50, %v1460_v18  ;;  %v1429_v7 = vmax.f32 %v1365_v37, 0.0  ;;  %v1318_v44 = vadd.f32 %v2501_v61, %v1247_v27  ;;  %v1334_v12 = vadd.f32 %v2501_v61, %v1263_v26 }
 0x231   : > { %v1445_v60 = vmax.f32 %v1381_v58, %v1397_v23  ;;  %v1350_v10 = vadd.f32 %v2501_v61, %v1279_v6  ;;  %v1366_v29 = vadd.f32 %v2501_v61, %v1295_v8  ;;  %v1248_v52 = vmul.f32 %v2857_v41, %v2499_v5 }
 0x232   : > { %1493 = vst.msk [vmem:[%s1957_s8 + $0x58] sm:$0xff] %vm1481_vm6, %v1476_v9  ;;  %v1461_v45 = vmax.f32 %v1413_v39, %v1429_v7  ;;  %v1264_v43 = vmul.f32 %v2858_v20, %v2499_v5  ;;  %v1382_v25 = vmax.f32 %v1318_v44, 0.0  ;;  %v1398_v57 = vmax.f32 %v1334_v12, 0.0 }
 0x233   : > { %v1414_v11 = vmax.f32 %v1350_v10, 0.0  ;;  %v1280_v21 = vmul.f32 %v2859_v32, %v2499_v5  ;;  %v1430_v62 = vmax.f32 %v1366_v29, 0.0  ;;  %v1296_v46 = vmul.f32 %v2860_v19, %v2499_v5 }
 0x234   : > { %v1477_v48 = vmax.f32 %v1445_v60, %v1461_v45  ;;  %v1319_v63 = vadd.f32 %v2501_v61, %v1248_v52  ;;  %v1446_v13 = vmax.f32 %v1382_v25, %v1398_v57  ;;  %v1335_v16 = vadd.f32 %v2501_v61, %v1264_v43 }
 0x235   : > { %v1351_v49 = vadd.f32 %v2501_v61, %v1280_v21  ;;  %v1249_v0 = vmul.f32 %v2861_v34, %v2499_v5  ;;  %v1462_v17 = vmax.f32 %v1414_v11, %v1430_v62  ;;  %v1367_v14 = vadd.f32 %v2501_v61, %v1296_v46 }
 0x236   : > { %1494 = vst.msk [vmem:[%s1957_s8 + $0x60] sm:$0xff] %vm1481_vm6, %v1477_v48  ;;  %v1383_v24 = vmax.f32 %v1319_v63, 0.0  ;;  %v1265_v3 = vmul.f32 %v2862_v47, %v2499_v5  ;;  %v1399_v53 = vmax.f32 %v1335_v16, 0.0  ;;  %v1281_v42 = vmul.f32 %v2094_v1, %v2499_v5 }
 0x237   : > { %v1415_v36 = vmax.f32 %v1351_v49, 0.0  ;;  %v1297_v31 = vmul.f32 %v2863_v54, %v2499_v5  ;;  %v1478_v2 = vmax.f32 %v1446_v13, %v1462_v17  ;;  %v1431_v15 = vmax.f32 %v1367_v14, 0.0 }
 0x238   : > { %v1320_v22 = vadd.f32 %v2501_v61, %v1249_v0  ;;  %v1336_v35 = vadd.f32 %v2501_v61, %v1265_v3  ;;  %v1447_v55 = vmax.f32 %v1383_v24, %v1399_v53  ;;  %v1352_v28 = vadd.f32 %v2501_v61, %v1281_v42 }
 0x239   : > { %v1368_v4 = vadd.f32 %v2501_v61, %v1297_v31  ;;  %1495 = vst.msk [vmem:[%s1957_s8 + $0x68] sm:$0xff] %vm1481_vm6, %v1478_v2  ;;  %v1463_v50 = vmax.f32 %v1415_v36, %v1431_v15 }
 0x23a   : > { %v1384_v1 = vmax.f32 %v1320_v22, 0.0  ;;  %v1400_v33 = vmax.f32 %v1336_v35, 0.0  ;;  %v1416_v40 = vmax.f32 %v1352_v28, 0.0 }
 0x23b   : > { %v1432_v5 = vmax.f32 %v1368_v4, 0.0  ;;  %v1479_v18 = vmax.f32 %v1447_v55, %v1463_v50 }
 0x23c   : > { %v1448_v51 = vmax.f32 %v1384_v1, %v1400_v33 }
 0x23d   : > { %v1464_v37 = vmax.f32 %v1416_v40, %v1432_v5  ;;  %1496 = vst.msk [vmem:[%s1957_s8 + $0x70] sm:$0xff] %vm1481_vm6, %v1479_v18 }
 0x23f   : > { %v1480_v56 = vmax.f32 %v1448_v51, %v1464_v37 }
 0x241   : > { %1497 = vst.msk [vmem:[%s1957_s8 + $0x78] sm:$0xff] %vm1481_vm6, %v1480_v56 }
 0x242 PF: > { %s14_s19 = sadd.s32 1, %s1880_s19   ;;  %s2864_s15 = smov %s1872_s17 }
 0x243   : > { %p11_p0 = scmp.ge.s32.totalorder %s14_s19, 6   ;;  %s2865_s16 = smov %s1876_s18 }
 0x244   : > { %s2866_s17 = smov %s2869_s20  ;;  %s2867_s18 = smov %s2873_s21 }
 0x245   :  { %13 = sbr.rel (!%p11_p0) target bundleno = 3 (0x3), region = 82 }

</bundles_post_ra>
